<compile_context>
chip_gen: v5e
topology: v5e:2x2
jax: 0.10.0
libtpu: 0.0.40
codegen_flags: <defaults>
</compile_context>

<pallas_src>
from typing import NamedTuple

import jax
import jax.numpy as jnp
from jax.experimental import pallas as pl
from jax.experimental.pallas import tpu as pltpu


def _round_up(n, m):
    return ((n + m - 1) // m) * m


def _pick_tb(batch):
    """Batch tile: multiple of 8 sublanes; >=2 grid steps when splittable."""
    b8 = _round_up(batch, 8)
    if b8 <= 8:
        return 8                       # nothing to split across cores
    tb = min(512, b8)                  # big tiles amortize per-step overhead (v5e/v6e)
    while _round_up(batch, tb) // tb < 2 and tb > 8:
        tb = max(8, tb // 2)           # give v7x megacore >=1 step per TensorCore
    return tb


class PackedParams(NamedTuple):
    w1_p: jax.Array   # (K_PAD, 512) bf16, zero-padded rows d_in..K_PAD
    w2_b: jax.Array   # (512, 512)   bf16
    w3_p: jax.Array   # (512, N_PAD) bf16, zero-padded cols d_out..N_PAD
    b_cat: jax.Array  # (1, 512 + 512 + N_PAD) f32  [b1 | b2 | b3 padded]
    d_in: int
    d_h: int
    d_out: int
    k_pad: int
    n_pad: int


def pack_params(params):
    """One-time bf16 cast + padding of the weights. Reuse across every call."""
    w1, b1, w2, b2, w3, b3 = params
    d_in, d_h = w1.shape               # 784, 512
    d_out = w3.shape[1]                # 10
    k_pad = _round_up(d_in, 256)       # 1024: clean 256-wide MXU contraction passes
    n_pad = _round_up(d_out, 128)      # 128: lane-dense output store (no vst.msk)

    # PyTorch nn.Linear biases are 1-D (d,); reshape defensively to (1, d).
    b1 = jnp.asarray(b1, jnp.float32).reshape(1, d_h)
    b2 = jnp.asarray(b2, jnp.float32).reshape(1, d_h)
    b3 = jnp.asarray(b3, jnp.float32).reshape(1, d_out)

    w1_p = jnp.zeros((k_pad, d_h), jnp.bfloat16).at[:d_in, :].set(w1.astype(jnp.bfloat16))
    w2_b = w2.astype(jnp.bfloat16)
    w3_p = jnp.zeros((d_h, n_pad), jnp.bfloat16).at[:, :d_out].set(w3.astype(jnp.bfloat16))
    b_cat = jnp.concatenate(
        [b1, b2, jnp.pad(b3, ((0, 0), (0, n_pad - d_out)))], axis=1)
    return PackedParams(w1_p, w2_b, w3_p, b_cat, d_in, d_h, d_out, k_pad, n_pad)


def mlp_kernel(x_ref, w1_ref, w2_ref, w3_ref, b_ref, o_ref):
    d_h = w1_ref.shape[1]                       # 512
    # x arrives f32; cast to bf16 here (cheap VPU pack hidden under the MXU).
    x = x_ref[...].astype(jnp.bfloat16)
    b1 = b_ref[:, :d_h]
    b2 = b_ref[:, d_h:2 * d_h]
    b3 = b_ref[:, 2 * d_h:]
    # bf16 matmuls with f32 accumulation; bias-add / ReLU in f32 (v5e VPU has no bf16).
    h1 = jnp.dot(x, w1_ref[...], preferred_element_type=jnp.float32) + b1
    h1 = jnp.maximum(h1, 0.0)
    h2 = jnp.dot(h1.astype(jnp.bfloat16), w2_ref[...],
                 preferred_element_type=jnp.float32) + b2
    h2 = jnp.maximum(h2, 0.0)
    logits = jnp.dot(h2.astype(jnp.bfloat16), w3_ref[...],
                     preferred_element_type=jnp.float32) + b3
    o_ref[...] = logits.astype(o_ref.dtype)


def neural_network_forward(x_nchw, packed: PackedParams):
    """x_nchw: (B, 1, 28, 28) float32 -> logits (B, 10) float32."""
    B = x_nchw.shape[0]
    d_in, d_h, d_out = packed.d_in, packed.d_h, packed.d_out
    k_pad, n_pad = packed.k_pad, packed.n_pad

    TB = _pick_tb(B)
    B_PAD = _round_up(B, TB)

    # nn.Flatten + single fused pad; keep f32 (cast happens inside the kernel).
    x_flat = x_nchw.reshape(B, -1)
    x_p = jnp.pad(x_flat, ((0, B_PAD - B), (0, k_pad - d_in)))

    grid = (B_PAD // TB,)
    flops = 2 * B_PAD * (k_pad * d_h + d_h * d_h + d_h * n_pad)
    bytes_accessed = (
        x_p.size * 4
        + packed.w1_p.size * 2 + packed.w2_b.size * 2 + packed.w3_p.size * 2
        + packed.b_cat.size * 4
        + B_PAD * n_pad * 4
    )

    out = pl.pallas_call(
        mlp_kernel,
        out_shape=jax.ShapeDtypeStruct((B_PAD, n_pad), jnp.float32),
        grid=grid,
        in_specs=[
            pl.BlockSpec((TB, k_pad), lambda i: (i, 0)),        # activations stream
            pl.BlockSpec((k_pad, d_h), lambda i: (0, 0)),       # weights stay resident
            pl.BlockSpec((d_h, d_h), lambda i: (0, 0)),
            pl.BlockSpec((d_h, n_pad), lambda i: (0, 0)),
            pl.BlockSpec((1, 2 * d_h + n_pad), lambda i: (0, 0)),  # fused biases
        ],
        out_specs=pl.BlockSpec((TB, n_pad), lambda i: (i, 0)),   # lane-dense store
        compiler_params=pltpu.CompilerParams(
            dimension_semantics=("parallel",),
            vmem_limit_bytes=16 << 20,
        ),
        cost_estimate=pl.CostEstimate(
            flops=flops, transcendentals=0, bytes_accessed=bytes_accessed),
    )(x_p, packed.w1_p, packed.w2_b, packed.w3_p, packed.b_cat)

    # Padded batch rows produce bias-valued logits; slice them off here.
    return out[:B, :d_out]


def init_params(key):
    """Deterministic init matching the layer shapes of the PyTorch module."""
    k1, k2, k3, k4, k5, k6 = jax.random.split(key, 6)
    d_in, d_h, d_out = 28 * 28, 512, 10

    def uniform(k, shape, fan_in):
        bound = 1.0 / jnp.sqrt(fan_in)
        return jax.random.uniform(k, shape, jnp.float32, -bound, bound)

    w1 = uniform(k1, (d_in, d_h), d_in)
    b1 = uniform(k2, (d_h,), d_in)      # 1-D, like PyTorch nn.Linear.bias
    w2 = uniform(k3, (d_h, d_h), d_h)
    b2 = uniform(k4, (d_h,), d_h)
    w3 = uniform(k5, (d_h, d_out), d_h)
    b3 = uniform(k6, (d_out,), d_h)
    return (w1, b1, w2, b2, w3, b3)


def reference_forward_f32(x_nchw, params):
    """True f32 reference with PyTorch semantics (Flatten + Linear/ReLU stack)."""
    w1, b1, w2, b2, w3, b3 = params
    x = x_nchw.reshape(x_nchw.shape[0], -1)
    h = jnp.maximum(x @ w1 + b1, 0.0)
    h = jnp.maximum(h @ w2 + b2, 0.0)
    return h @ w3 + b3


if __name__ == "__main__":
    key = jax.random.PRNGKey(0)
    kx, kp = jax.random.split(key)
    x = jax.random.normal(kx, (8, 1, 28, 28), jnp.float32)  # batch=8, MNIST-like
    params = init_params(kp)

    packed = pack_params(params)        # one-time prep; reuse across serving calls
    logits = neural_network_forward(x, packed)
    logits = jax.block_until_ready(logits)

    ref = reference_forward_f32(x, params)
    assert logits.shape == (8, 10)
    # bf16-weight kernel vs. f32 reference: loose-but-genuine tolerance.
    assert jnp.allclose(logits, ref, atol=5e-2, rtol=5e-2)
    print("KERNEL_OK")
</pallas_src>

<mosaic_0001>
module attributes {stable_mosaic.version = 11 : i64} {
  func.func @mlp_kernel(%arg0: i32, %arg1: memref<8x1024xf32, #tpu.memory_space<vmem>>, %arg2: memref<1024x512xbf16, #tpu.memory_space<vmem>>, %arg3: memref<512x512xbf16, #tpu.memory_space<vmem>>, %arg4: memref<512x128xbf16, #tpu.memory_space<vmem>>, %arg5: memref<1x1152xf32, #tpu.memory_space<vmem>>, %arg6: memref<8x128xf32, #tpu.memory_space<vmem>>) attributes {dimension_semantics = [#tpu.dimension_semantics<parallel>], iteration_bounds = array<i64: 1>, scalar_prefetch = 0 : i64, scratch_operands = 0 : i64, tpu.core_type = #tpu.core_type<tc>, window_params = [{transform_indices = @transform_0, window_bounds = array<i64: 8, 1024>}, {pipeline_mode = #tpu.pipeline_mode<synchronous>, transform_indices = @transform_1, window_bounds = array<i64: 1024, 512>}, {pipeline_mode = #tpu.pipeline_mode<synchronous>, transform_indices = @transform_2, window_bounds = array<i64: 512, 512>}, {pipeline_mode = #tpu.pipeline_mode<synchronous>, transform_indices = @transform_3, window_bounds = array<i64: 512, 128>}, {pipeline_mode = #tpu.pipeline_mode<synchronous>, transform_indices = @transform_4, window_bounds = array<i64: 1, 1152>}, {transform_indices = @transform_5, window_bounds = array<i64: 8, 128>}]} {
    %c0 = arith.constant 0 : index
    %c0_0 = arith.constant 0 : index
    %0 = vector.load %arg1[%c0, %c0_0] : memref<8x1024xf32, #tpu.memory_space<vmem>>, vector<8x1024xf32>
    %1 = arith.truncf %0 : vector<8x1024xf32> to vector<8x1024xbf16>
    %c0_1 = arith.constant 0 : index
    %c0_2 = arith.constant 0 : index
    %2 = vector.load %arg5[%c0_1, %c0_2] : memref<1x1152xf32, #tpu.memory_space<vmem>>, vector<1x512xf32>
    %c0_3 = arith.constant 0 : index
    %c512 = arith.constant 512 : index
    %3 = vector.load %arg5[%c0_3, %c512] : memref<1x1152xf32, #tpu.memory_space<vmem>>, vector<1x512xf32>
    %c0_4 = arith.constant 0 : index
    %c1024 = arith.constant 1024 : index
    %4 = vector.load %arg5[%c0_4, %c1024] : memref<1x1152xf32, #tpu.memory_space<vmem>>, vector<1x128xf32>
    %c0_5 = arith.constant 0 : index
    %c0_6 = arith.constant 0 : index
    %5 = vector.load %arg2[%c0_5, %c0_6] : memref<1024x512xbf16, #tpu.memory_space<vmem>>, vector<1024x512xbf16>
    %cst = arith.constant dense<0.000000e+00> : vector<8x512xf32>
    %6 = tpu.matmul %1, %5, %cst {dimension_numbers = #tpu.dot_dimension_numbers<[1], [0], [0], [1], [0, 0, 1, 1], [], []>} : vector<8x1024xbf16>, vector<1024x512xbf16>, vector<8x512xf32> -> vector<8x512xf32>
    %7 = vector.broadcast %2 : vector<1x512xf32> to vector<8x512xf32>
    %8 = arith.addf %6, %7 : vector<8x512xf32>
    %cst_7 = arith.constant 0.000000e+00 : f32
    %9 = vector.broadcast %cst_7 : f32 to vector<8x512xf32>
    %10 = arith.maximumf %8, %9 : vector<8x512xf32>
    %11 = arith.truncf %10 : vector<8x512xf32> to vector<8x512xbf16>
    %c0_8 = arith.constant 0 : index
    %c0_9 = arith.constant 0 : index
    %12 = vector.load %arg3[%c0_8, %c0_9] : memref<512x512xbf16, #tpu.memory_space<vmem>>, vector<512x512xbf16>
    %cst_10 = arith.constant dense<0.000000e+00> : vector<8x512xf32>
    %13 = tpu.matmul %11, %12, %cst_10 {dimension_numbers = #tpu.dot_dimension_numbers<[1], [0], [0], [1], [0, 0, 1, 1], [], []>} : vector<8x512xbf16>, vector<512x512xbf16>, vector<8x512xf32> -> vector<8x512xf32>
    %14 = vector.broadcast %3 : vector<1x512xf32> to vector<8x512xf32>
    %15 = arith.addf %13, %14 : vector<8x512xf32>
    %cst_11 = arith.constant 0.000000e+00 : f32
    %16 = vector.broadcast %cst_11 : f32 to vector<8x512xf32>
    %17 = arith.maximumf %15, %16 : vector<8x512xf32>
    %18 = arith.truncf %17 : vector<8x512xf32> to vector<8x512xbf16>
    %c0_12 = arith.constant 0 : index
    %c0_13 = arith.constant 0 : index
    %19 = vector.load %arg4[%c0_12, %c0_13] : memref<512x128xbf16, #tpu.memory_space<vmem>>, vector<512x128xbf16>
    %cst_14 = arith.constant dense<0.000000e+00> : vector<8x128xf32>
    %20 = tpu.matmul %18, %19, %cst_14 {dimension_numbers = #tpu.dot_dimension_numbers<[1], [0], [0], [1], [0, 0, 1, 1], [], []>} : vector<8x512xbf16>, vector<512x128xbf16>, vector<8x128xf32> -> vector<8x128xf32>
    %21 = vector.broadcast %4 : vector<1x128xf32> to vector<8x128xf32>
    %22 = arith.addf %20, %21 : vector<8x128xf32>
    %c0_15 = arith.constant 0 : index
    %c0_16 = arith.constant 0 : index
    %23 = vector.load %arg6[%c0_15, %c0_16] : memref<8x128xf32, #tpu.memory_space<vmem>>, vector<8x128xf32>
    tpu.vector_store %arg6[%c0_15, %c0_16], %22 {strides = array<i32>} : memref<8x128xf32, #tpu.memory_space<vmem>>, vector<8x128xf32>,
    return
  }
  func.func @transform_0(%arg0: i32) -> (i32, i32) {
    %c0_i32 = arith.constant 0 : i32
    %c0_i32_0 = arith.constant 0 : i32
    return %arg0, %c0_i32 : i32, i32
  }
  func.func @transform_1(%arg0: i32) -> (i32, i32) {
    %c0_i32 = arith.constant 0 : i32
    %c0_i32_0 = arith.constant 0 : i32
    %c0_i32_1 = arith.constant 0 : i32
    return %c0_i32, %c0_i32_0 : i32, i32
  }
  func.func @transform_2(%arg0: i32) -> (i32, i32) {
    %c0_i32 = arith.constant 0 : i32
    %c0_i32_0 = arith.constant 0 : i32
    %c0_i32_1 = arith.constant 0 : i32
    return %c0_i32, %c0_i32_0 : i32, i32
  }
  func.func @transform_3(%arg0: i32) -> (i32, i32) {
    %c0_i32 = arith.constant 0 : i32
    %c0_i32_0 = arith.constant 0 : i32
    %c0_i32_1 = arith.constant 0 : i32
    return %c0_i32, %c0_i32_0 : i32, i32
  }
  func.func @transform_4(%arg0: i32) -> (i32, i32) {
    %c0_i32 = arith.constant 0 : i32
    %c0_i32_0 = arith.constant 0 : i32
    %c0_i32_1 = arith.constant 0 : i32
    return %c0_i32, %c0_i32_0 : i32, i32
  }
  func.func @transform_5(%arg0: i32) -> (i32, i32) {
    %c0_i32 = arith.constant 0 : i32
    %c0_i32_0 = arith.constant 0 : i32
    return %arg0, %c0_i32 : i32, i32
  }
}

</mosaic_0001>

<bundles_post_ra>
// kernel: tpu_custom_call.1
= control target key start
LH: loop header
LB: loop body
LE: loop exit
PB: predicated region body
PF: predicated region fallthrough
CT: control target
= control target key end

     0   :  { %10 = vsyncpa [#allocation3], 0  ;;  %s5849_s0 = inlined_call_operand.hbm [shape: f32[8,1024], index: 0, kind: input, shape index: {}]   ;;  %s5850_s1 = inlined_call_operand.hbm [shape: bf16[1024,512], index: 1, kind: input, shape index: {}]   ;;  %s5851_s2 = inlined_call_operand.hbm [shape: bf16[512,512], index: 2, kind: input, shape index: {}]   ;;  %s5852_s3 = inlined_call_operand.hbm [shape: bf16[512,128], index: 3, kind: input, shape index: {}]   ;;  %s5853_s4 = inlined_call_operand.hbm [shape: f32[1,1152], index: 4, kind: input, shape index: {}]   ;;  %s5854_s5 = inlined_call_operand.hbm [shape: f32[8,128], index: 5, kind: output, shape index: {}]  }
   0x1   :  { %11 = vsyncpa [#allocation6], 0 }
   0x2   :  { %12 = vsyncpa [#allocation9], 0  ;;  %s29_s20 = sshll.u32 %s5850_s1, 4  ;;  %s30_s20 = int_to_ptr.hbm [resolvable:$true] %s29_s20 }
   0x3   :  { %13 = vsyncpa [#allocation4], 0  ;;  %s5651_s21 = smov [#allocation5]   ;;  %s55_s25 = sshll.u32 %s5852_s3, 4  ;;  %s56_s25 = int_to_ptr.hbm [resolvable:$true] %s55_s25 }
   0x4   :  { %s31_s22 = sshll.u32 %s5651_s21, 4  ;;  %s5652_s26 = smov 256   ;;  %s32_s22 = int_to_ptr.vmem [resolvable:$true] %s31_s22 }
   0x5   :  { %s5653_s27 = smov 16   ;;  %s5654_s28 = smov [#allocation8]  }
   0x6   :  { %37 = dma.hbm_to_vmem [thread:$0]  %s30_s20, 32768, %s32_s22, [#allocation6], %s5652_s26, %s5652_s26, %s5653_s27  }
   0x7   :  { %s57_s29 = sshll.u32 %s5654_s28, 4  ;;  %s5655_s30 = smov 64   ;;  %s58_s29 = int_to_ptr.vmem [resolvable:$true] %s57_s29 }
   0x8   :  { %s5656_s6 = smov 4   ;;  %s19_s8 = sshll.u32 %s5849_s0, 4  ;;  %s20_s8 = int_to_ptr.hbm [resolvable:$true] %s19_s8 }
   0x9   :  { %63 = dma.hbm_to_vmem [thread:$0]  %s56_s25, 4096, %s58_s29, [#allocation9], %s5655_s30, %s5655_s30, %s5656_s6  }
   0xa   :  { %s5657_s9 = smov [#allocation2]   ;;  %s42_s12 = sshll.u32 %s5851_s2, 4  ;;  %s43_s12 = int_to_ptr.hbm [resolvable:$true] %s42_s12 }
   0xb   :  { %s21_s10 = sshll.u32 %s5657_s9, 4  ;;  %s5658_s13 = smov [#allocation7]   ;;  %s22_s10 = int_to_ptr.vmem [resolvable:$true] %s21_s10 }
   0xc   :  { %24 = dma.hbm_to_vmem [thread:$0]  %s20_s8, 1024, %s22_s10, [#allocation3]  }
   0xd   :  { %s44_s14 = sshll.u32 %s5658_s13, 4  ;;  %s69_s17 = sshll.u32 %s5853_s4, 4  ;;  %s45_s14 = int_to_ptr.vmem [resolvable:$true] %s44_s14  ;;  %s70_s17 = int_to_ptr.hbm [resolvable:$true] %s69_s17 }
   0xe   :  { %50 = dma.hbm_to_vmem [thread:$0]  %s43_s12, 16384, %s45_s14, [#allocation6], %s5652_s26, %s5652_s26, %s5653_s27  }
   0xf   :  { %s5659_s0 = smov [#allocation10]  }
  0x10   :  { %s71_s18 = sshll.u32 %s5659_s0, 4  ;;  %s72_s18 = int_to_ptr.vmem [resolvable:$true] %s71_s18 }
  0x11   :  { %74 = dma.hbm_to_vmem [thread:$0]  %s70_s17, 144, %s72_s18, [#allocation9]  }
  0x12   :  { %5643 = dma.done.wait [#allocation3], 1024  }
  0x13   :  { %5644 = vsyncadd [#allocation3], 4294966272 }
  0x14   :  { %5645 = dma.done.wait [#allocation6], 49152  }
  0x15   :  { %5646 = vsyncadd [#allocation6], 4294918144 }
  0x16   :  { %5647 = dma.done.wait [#allocation9], 4240  }
  0x17   :  { %5648 = vsyncadd [#allocation9], 4294963056  ;;  %v3521_v0 = vld [vmem:[#allocation5 + $0xe0] sm:$0xf]  ;;  %v5101_v1 = vld [vmem:[#allocation5 + $0xec] sm:$0xf0] }
  0x18   :  { %v3649_v2 = vld [vmem:[#allocation5 + $0x1e0] sm:$0xf]  ;;  %v3522_v3 = vor.u32 %v5101_v1, %v3521_v0  ;;  %v5133_v4 = vld [vmem:[#allocation5 + $0x1ec] sm:$0xf0]  ;;  %s5660_s2 = smov [#allocation11]   ;;  %s3395_s21 = sshll.u32 %s5854_s5, 4  ;;  %s3396_s21 = int_to_ptr.hbm [resolvable:$true] %s3395_s21 }
  0x19   :  { %v3777_v5 = vld [vmem:[#allocation5 + $0x2e0] sm:$0xf]  ;;  %v5165_v6 = vld [vmem:[#allocation5 + $0x2ec] sm:$0xf0]  ;;  %v3650_v7 = vor.u32 %v5133_v4, %v3649_v2  ;;  %s3393_s4 = sshll.u32 %s5660_s2, 4  ;;  %s3394_s4 = int_to_ptr.vmem [resolvable:$true] %s3393_s4 }
  0x1a   :  { %v3778_v8 = vor.u32 %v5165_v6, %v3777_v5  ;;  %v3905_v9 = vld [vmem:[#allocation5 + $0x3e0] sm:$0xf]  ;;  %v5197_v10 = vld [vmem:[#allocation5 + $0x3ec] sm:$0xf0]  ;;  %1659 = vmatpush.bf16.msra.mxu0 %v3522_v3 }
  0x1b   :  { %v3505_v11 = vld [vmem:[#allocation5 + $0xc0] sm:$0xf]  ;;  %v3906_v12 = vor.u32 %v5197_v10, %v3905_v9  ;;  %v5097_v13 = vld [vmem:[#allocation5 + $0xcc] sm:$0xf0]  ;;  %1672 = vmatpush.bf16.msra.mxu1 %v3650_v7 }
  0x1c   :  { %v3633_v14 = vld [vmem:[#allocation5 + $0x1c0] sm:$0xf]  ;;  %v5129_v15 = vld [vmem:[#allocation5 + $0x1cc] sm:$0xf0]  ;;  %1685 = vmatpush.bf16.msra.mxu2 %v3778_v8  ;;  %v3506_v16 = vor.u32 %v5097_v13, %v3505_v11 }
  0x1d   :  { %v3634_v17 = vor.u32 %v5129_v15, %v3633_v14  ;;  %v3761_v18 = vld [vmem:[#allocation5 + $0x2c0] sm:$0xf]  ;;  %v5161_v19 = vld [vmem:[#allocation5 + $0x2cc] sm:$0xf0]  ;;  %1698 = vmatpush.bf16.msra.mxu3 %v3906_v12 }
  0x1e   :  { %v3889_v20 = vld [vmem:[#allocation5 + $0x3c0] sm:$0xf]  ;;  %v3762_v21 = vor.u32 %v5161_v19, %v3761_v18  ;;  %v5193_v22 = vld [vmem:[#allocation5 + $0x3cc] sm:$0xf0]  ;;  %1660 = vmatpush.bf16.msra.mxu0 %v3506_v16 }
  0x1f   :  { %v3489_v23 = vld [vmem:[#allocation5 + $0xa0] sm:$0xf]  ;;  %v5093_v24 = vld [vmem:[#allocation5 + $0xac] sm:$0xf0]  ;;  %v3890_v25 = vor.u32 %v5193_v22, %v3889_v20  ;;  %1673 = vmatpush.bf16.msra.mxu1 %v3634_v17 }
  0x20   :  { %v3617_v26 = vld [vmem:[#allocation5 + $0x1a0] sm:$0xf]  ;;  %v5125_v27 = vld [vmem:[#allocation5 + $0x1ac] sm:$0xf0]  ;;  %v3490_v29 = vor.u32 %v5093_v24, %v3489_v23  ;;  %1686 = vmatpush.bf16.msra.mxu2 %v3762_v21 }
  0x21   :  { %v3745_v28 = vld [vmem:[#allocation5 + $0x2a0] sm:$0xf]  ;;  %v5157_v30 = vld [vmem:[#allocation5 + $0x2ac] sm:$0xf0]  ;;  %v3618_v33 = vor.u32 %v5125_v27, %v3617_v26  ;;  %1699 = vmatpush.bf16.msra.mxu3 %v3890_v25 }
  0x22   :  { %v3873_v31 = vld [vmem:[#allocation5 + $0x3a0] sm:$0xf]  ;;  %v5189_v32 = vld [vmem:[#allocation5 + $0x3ac] sm:$0xf0]  ;;  %v3746_v34 = vor.u32 %v5157_v30, %v3745_v28  ;;  %1661 = vmatpush.bf16.msra.mxu0 %v3490_v29 }
  0x23   :  { %v3473_v35 = vld [vmem:[#allocation5 + $0x80] sm:$0xf]  ;;  %v5089_v36 = vld [vmem:[#allocation5 + $0x8c] sm:$0xf0]  ;;  %v3874_v38 = vor.u32 %v5189_v32, %v3873_v31  ;;  %1674 = vmatpush.bf16.msra.mxu1 %v3618_v33 }
  0x24   :  { %v3601_v37 = vld [vmem:[#allocation5 + $0x180] sm:$0xf]  ;;  %v5121_v39 = vld [vmem:[#allocation5 + $0x18c] sm:$0xf0]  ;;  %v3474_v44 = vor.u32 %v5089_v36, %v3473_v35  ;;  %1687 = vmatpush.bf16.msra.mxu2 %v3746_v34 }
  0x25   :  { %v3729_v40 = vld [vmem:[#allocation5 + $0x280] sm:$0xf]  ;;  %v5153_v41 = vld [vmem:[#allocation5 + $0x28c] sm:$0xf0]  ;;  %v3602_v45 = vor.u32 %v5121_v39, %v3601_v37  ;;  %1700 = vmatpush.bf16.msra.mxu3 %v3874_v38 }
  0x26   :  { %v3857_v42 = vld [vmem:[#allocation5 + $0x380] sm:$0xf]  ;;  %v5185_v43 = vld [vmem:[#allocation5 + $0x38c] sm:$0xf0]  ;;  %v3730_v46 = vor.u32 %v5153_v41, %v3729_v40  ;;  %1662 = vmatpush.bf16.msra.mxu0 %v3474_v44 }
  0x27   :  { %v3457_v47 = vld [vmem:[#allocation5 + $0x60] sm:$0xf]  ;;  %v5085_v48 = vld [vmem:[#allocation5 + $0x6c] sm:$0xf0]  ;;  %v3858_v50 = vor.u32 %v5185_v43, %v3857_v42  ;;  %1675 = vmatpush.bf16.msra.mxu1 %v3602_v45 }
  0x28   :  { %v3585_v49 = vld [vmem:[#allocation5 + $0x160] sm:$0xf]  ;;  %v5117_v51 = vld [vmem:[#allocation5 + $0x16c] sm:$0xf0]  ;;  %v3458_v56 = vor.u32 %v5085_v48, %v3457_v47  ;;  %1688 = vmatpush.bf16.msra.mxu2 %v3730_v46 }
  0x29   :  { %v3713_v52 = vld [vmem:[#allocation5 + $0x260] sm:$0xf]  ;;  %v5149_v53 = vld [vmem:[#allocation5 + $0x26c] sm:$0xf0]  ;;  %v3586_v57 = vor.u32 %v5117_v51, %v3585_v49  ;;  %1701 = vmatpush.bf16.msra.mxu3 %v3858_v50 }
  0x2a   :  { %v3841_v54 = vld [vmem:[#allocation5 + $0x360] sm:$0xf]  ;;  %v5181_v55 = vld [vmem:[#allocation5 + $0x36c] sm:$0xf0]  ;;  %v3714_v58 = vor.u32 %v5149_v53, %v3713_v52  ;;  %1663 = vmatpush.bf16.msra.mxu0 %v3458_v56 }
  0x2b   :  { %v3441_v59 = vld [vmem:[#allocation5 + $0x40] sm:$0xf]  ;;  %v5081_v60 = vld [vmem:[#allocation5 + $0x4c] sm:$0xf0]  ;;  %v3842_v62 = vor.u32 %v5181_v55, %v3841_v54  ;;  %1676 = vmatpush.bf16.msra.mxu1 %v3586_v57 }
  0x2c   :  { %v3569_v61 = vld [vmem:[#allocation5 + $0x140] sm:$0xf]  ;;  %v5113_v63 = vld [vmem:[#allocation5 + $0x14c] sm:$0xf0]  ;;  %v3442_v4 = vor.u32 %v5081_v60, %v3441_v59  ;;  %1689 = vmatpush.bf16.msra.mxu2 %v3714_v58 }
  0x2d   :  { %v3697_v0 = vld [vmem:[#allocation5 + $0x240] sm:$0xf]  ;;  %v5145_v1 = vld [vmem:[#allocation5 + $0x24c] sm:$0xf0]  ;;  %v3570_v5 = vor.u32 %v5113_v63, %v3569_v61  ;;  %1702 = vmatpush.bf16.msra.mxu3 %v3842_v62 }
  0x2e   :  { %v3825_v2 = vld [vmem:[#allocation5 + $0x340] sm:$0xf]  ;;  %v5177_v3 = vld [vmem:[#allocation5 + $0x34c] sm:$0xf0]  ;;  %v3698_v6 = vor.u32 %v5145_v1, %v3697_v0  ;;  %1664 = vmatpush.bf16.msra.mxu0 %v3442_v4 }
  0x2f   :  { %v3425_v7 = vld [vmem:[#allocation5 + $0x20] sm:$0xf]  ;;  %v5077_v8 = vld [vmem:[#allocation5 + $0x2c] sm:$0xf0]  ;;  %v3826_v10 = vor.u32 %v5177_v3, %v3825_v2  ;;  %1677 = vmatpush.bf16.msra.mxu1 %v3570_v5 }
  0x30   :  { %v3553_v9 = vld [vmem:[#allocation5 + $0x120] sm:$0xf]  ;;  %v5109_v11 = vld [vmem:[#allocation5 + $0x12c] sm:$0xf0]  ;;  %v3426_v16 = vor.u32 %v5077_v8, %v3425_v7  ;;  %1690 = vmatpush.bf16.msra.mxu2 %v3698_v6 }
  0x31   :  { %v3681_v12 = vld [vmem:[#allocation5 + $0x220] sm:$0xf]  ;;  %v5141_v13 = vld [vmem:[#allocation5 + $0x22c] sm:$0xf0]  ;;  %v3554_v19 = vor.u32 %v5109_v11, %v3553_v9  ;;  %1703 = vmatpush.bf16.msra.mxu3 %v3826_v10  ;;  %v98_v10 = vld [vmem:[#allocation2 + $0x18] sm:$0xff] }
  0x32   :  { %v3809_v14 = vld [vmem:[#allocation5 + $0x320] sm:$0xf]  ;;  %v5173_v15 = vld [vmem:[#allocation5 + $0x32c] sm:$0xf0]  ;;  %v3682_v20 = vor.u32 %v5141_v13, %v3681_v12  ;;  %1665 = vmatpush.bf16.msra.mxu0 %v3426_v16 }
  0x33   :  { %v3409_v17 = vld [vmem:[#allocation5] sm:$0xf]  ;;  %v5073_v18 = vld [vmem:[#allocation5 + $0xc] sm:$0xf0]  ;;  %v3810_v24 = vor.u32 %v5173_v15, %v3809_v14  ;;  %1678 = vmatpush.bf16.msra.mxu1 %v3554_v19  ;;  %v5710_v15 = vpack.c.bf16 %v98_v10, %v98_v10  ;;  %v96_v19 = vld [vmem:[#allocation2 + $0x8] sm:$0xff] }
  0x34   :  { %v3537_v21 = vld [vmem:[#allocation5 + $0x100] sm:$0xf]  ;;  %v5105_v22 = vld [vmem:[#allocation5 + $0x10c] sm:$0xf0]  ;;  %v3410_v31 = vor.u32 %v5073_v18, %v3409_v17  ;;  %1691 = vmatpush.bf16.msra.mxu2 %v3682_v20  ;;  %v3651_v10 = vld [vmem:[#allocation5 + $0x1f0] sm:$0xf0] }
  0x35   :  { %v3665_v23 = vld [vmem:[#allocation5 + $0x200] sm:$0xf]  ;;  %v5137_v25 = vld [vmem:[#allocation5 + $0x20c] sm:$0xf0]  ;;  %v3538_v35 = vor.u32 %v5105_v22, %v3537_v21  ;;  %1704 = vmatpush.bf16.msra.mxu3 %v3810_v24 }
  0x36   :  { %v3793_v26 = vld [vmem:[#allocation5 + $0x300] sm:$0xf]  ;;  %v5169_v27 = vld [vmem:[#allocation5 + $0x30c] sm:$0xf0]  ;;  %v3666_v36 = vor.u32 %v5137_v25, %v3665_v23  ;;  %1666 = vmatpush.bf16.msra.mxu0 %v3410_v31  ;;  %v5715_v25 = vpack.c.bf16 %v96_v19, %v96_v19 }
  0x37   :  { %v4033_v28 = vld [vmem:[#allocation5 + $0x4e0] sm:$0xf]  ;;  %v5229_v29 = vld [vmem:[#allocation5 + $0x4ec] sm:$0xf0]  ;;  %v3794_v39 = vor.u32 %v5169_v27, %v3793_v26  ;;  %1679 = vmatpush.bf16.msra.mxu1 %v3538_v35 }
  0x38   :  { %v4161_v30 = vld [vmem:[#allocation5 + $0x5e0] sm:$0xf]  ;;  %v5261_v32 = vld [vmem:[#allocation5 + $0x5ec] sm:$0xf0]  ;;  %v4034_v40 = vor.u32 %v5229_v29, %v4033_v28  ;;  %1692 = vmatpush.bf16.msra.mxu2 %v3666_v36 }
  0x39   :  { %v4289_v33 = vld [vmem:[#allocation5 + $0x6e0] sm:$0xf]  ;;  %v5293_v34 = vld [vmem:[#allocation5 + $0x6ec] sm:$0xf0]  ;;  %v4162_v41 = vor.u32 %v5261_v32, %v4161_v30  ;;  %1705 = vmatpush.bf16.msra.mxu3 %v3794_v39 }
  0x3a   :  { %v4417_v37 = vld [vmem:[#allocation5 + $0x7e0] sm:$0xf]  ;;  %v5325_v38 = vld [vmem:[#allocation5 + $0x7ec] sm:$0xf0]  ;;  %v4290_v42 = vor.u32 %v5293_v34, %v4289_v33  ;;  %1711 = vmatpush.bf16.msrb.mxu0 %v4034_v40  ;;  %1680 = vmatmul.bf16.vlgmr.msra.gmra.mxu1 %v5715_v25 }
  0x3b   :  { %v4017_v43 = vld [vmem:[#allocation5 + $0x4c0] sm:$0xf]  ;;  %v5225_v44 = vld [vmem:[#allocation5 + $0x4cc] sm:$0xf0]  ;;  %v4418_v46 = vor.u32 %v5325_v38, %v4417_v37  ;;  %1724 = vmatpush.bf16.msrb.mxu1 %v4162_v41 }
  0x3c   :  { %v4145_v45 = vld [vmem:[#allocation5 + $0x5c0] sm:$0xf]  ;;  %v5257_v47 = vld [vmem:[#allocation5 + $0x5cc] sm:$0xf0]  ;;  %v4018_v52 = vor.u32 %v5225_v44, %v4017_v43  ;;  %1737 = vmatpush.bf16.msrb.mxu2 %v4290_v42  ;;  %1706 = vmatmul.bf16.vlgmr.msra.gmra.mxu3 %v5710_v15 }
  0x3d   :  { %v4273_v48 = vld [vmem:[#allocation5 + $0x6c0] sm:$0xf]  ;;  %v5289_v49 = vld [vmem:[#allocation5 + $0x6cc] sm:$0xf0]  ;;  %v4146_v54 = vor.u32 %v5257_v47, %v4145_v45  ;;  %1750 = vmatpush.bf16.msrb.mxu3 %v4418_v46 }
  0x3e   :  { %v4401_v50 = vld [vmem:[#allocation5 + $0x7c0] sm:$0xf]  ;;  %v5321_v51 = vld [vmem:[#allocation5 + $0x7cc] sm:$0xf0]  ;;  %v4274_v55 = vor.u32 %v5289_v49, %v4273_v48  ;;  %1712 = vmatpush.bf16.msrb.mxu0 %v4018_v52 }
  0x3f   :  { %v4001_v53 = vld [vmem:[#allocation5 + $0x4a0] sm:$0xf]  ;;  %v5221_v56 = vld [vmem:[#allocation5 + $0x4ac] sm:$0xf0]  ;;  %v4402_v59 = vor.u32 %v5321_v51, %v4401_v50  ;;  %1725 = vmatpush.bf16.msrb.mxu1 %v4146_v54 }
  0x40   :  { %v4129_v57 = vld [vmem:[#allocation5 + $0x5a0] sm:$0xf]  ;;  %v5253_v58 = vld [vmem:[#allocation5 + $0x5ac] sm:$0xf0]  ;;  %v4002_v0 = vor.u32 %v5221_v56, %v4001_v53  ;;  %1738 = vmatpush.bf16.msrb.mxu2 %v4274_v55 }
  0x41   :  { %v4257_v60 = vld [vmem:[#allocation5 + $0x6a0] sm:$0xf]  ;;  %v5285_v61 = vld [vmem:[#allocation5 + $0x6ac] sm:$0xf0]  ;;  %v4130_v1 = vor.u32 %v5253_v58, %v4129_v57  ;;  %1751 = vmatpush.bf16.msrb.mxu3 %v4402_v59 }
  0x42   :  { %v4385_v62 = vld [vmem:[#allocation5 + $0x7a0] sm:$0xf]  ;;  %v5317_v63 = vld [vmem:[#allocation5 + $0x7ac] sm:$0xf0]  ;;  %v4258_v5 = vor.u32 %v5285_v61, %v4257_v60  ;;  %1713 = vmatpush.bf16.msrb.mxu0 %v4002_v0 }
  0x43   :  { %v3985_v2 = vld [vmem:[#allocation5 + $0x480] sm:$0xf]  ;;  %v97_v3 = vld [vmem:[#allocation2 + $0x10] sm:$0xff]  ;;  %v4386_v11 = vor.u32 %v5317_v63, %v4385_v62  ;;  %1726 = vmatpush.bf16.msrb.mxu1 %v4130_v1 }
  0x44   :  { %v95_v4 = vld [vmem:[#allocation2] sm:$0xff]  ;;  %v5217_v6 = vld [vmem:[#allocation5 + $0x48c] sm:$0xf0]  ;;  %v5706_v8 = vpack.c.bf16 %v97_v3, %v97_v3  ;;  %1739 = vmatpush.bf16.msrb.mxu2 %v4258_v5  ;;  %v3523_v5 = vld [vmem:[#allocation5 + $0xf0] sm:$0xf0] }
  0x45   :  { %v4113_v7 = vld [vmem:[#allocation5 + $0x580] sm:$0xf]  ;;  %v5708_v9 = vpack.c.bf16 %v95_v4, %v95_v4  ;;  %v5249_v12 = vld [vmem:[#allocation5 + $0x58c] sm:$0xf0]  ;;  %v3986_v18 = vor.u32 %v5217_v6, %v3985_v2  ;;  %1752 = vmatpush.bf16.msrb.mxu3 %v4386_v11  ;;  %v5099_v4 = vld [vmem:[#allocation5 + $0xe4] sm:$0xf] }
  0x46   :  { %v4241_v13 = vld [vmem:[#allocation5 + $0x680] sm:$0xf]  ;;  %v5281_v14 = vld [vmem:[#allocation5 + $0x68c] sm:$0xf0]  ;;  %1693 = vmatmul.bf16.vlgmr.msra.gmra.mxu2 %v5706_v8  ;;  %v4114_v20 = vor.u32 %v5249_v12, %v4113_v7  ;;  %v5131_v6 = vld [vmem:[#allocation5 + $0x1e4] sm:$0xf] }
  0x47   :  { %v4369_v16 = vld [vmem:[#allocation5 + $0x780] sm:$0xf]  ;;  %v5313_v17 = vld [vmem:[#allocation5 + $0x78c] sm:$0xf0]  ;;  %1667 = vmatmul.bf16.vlgmr.msra.gmra.mxu0 %v5708_v9  ;;  %v4242_v21 = vor.u32 %v5281_v14, %v4241_v13  ;;  %v5163_v11 = vld [vmem:[#allocation5 + $0x2e4] sm:$0xf] }
  0x48   :  { %v3969_v22 = vld [vmem:[#allocation5 + $0x460] sm:$0xf]  ;;  %v5213_v23 = vld [vmem:[#allocation5 + $0x46c] sm:$0xf0]  ;;  %v4370_v26 = vor.u32 %v5313_v17, %v4369_v16  ;;  %1714 = vmatpush.bf16.msrb.mxu0 %v3986_v18  ;;  %1727 = vmatpush.bf16.msrb.mxu1 %v4114_v20  ;;  %v3779_v12 = vld [vmem:[#allocation5 + $0x2f0] sm:$0xf0]  ;;  %v3526_v20 = vor.u32 %v5099_v4, %v3523_v5 }
  0x49   :  { %v4097_v24 = vld [vmem:[#allocation5 + $0x560] sm:$0xf]  ;;  %v5245_v27 = vld [vmem:[#allocation5 + $0x56c] sm:$0xf0]  ;;  %v3970_v32 = vor.u32 %v5213_v23, %v3969_v22  ;;  %1740 = vmatpush.bf16.msrb.mxu2 %v4242_v21  ;;  %v5195_v16 = vld [vmem:[#allocation5 + $0x3e4] sm:$0xf] }
  0x4a   :  { %v4225_v28 = vld [vmem:[#allocation5 + $0x660] sm:$0xf]  ;;  %v5277_v29 = vld [vmem:[#allocation5 + $0x66c] sm:$0xf0]  ;;  %v4098_v33 = vor.u32 %v5245_v27, %v4097_v24  ;;  %1753 = vmatpush.bf16.msrb.mxu3 %v4370_v26  ;;  %v3907_v17 = vld [vmem:[#allocation5 + $0x3f0] sm:$0xf0]  ;;  %v3654_v24 = vor.u32 %v5131_v6, %v3651_v10  ;;  %v3782_v26 = vor.u32 %v5163_v11, %v3779_v12 }
  0x4b   :  { %v4353_v30 = vld [vmem:[#allocation5 + $0x760] sm:$0xf]  ;;  %v5309_v31 = vld [vmem:[#allocation5 + $0x76c] sm:$0xf0]  ;;  %v4226_v34 = vor.u32 %v5277_v29, %v4225_v28  ;;  %v5095_v21 = vld [vmem:[#allocation5 + $0xc4] sm:$0xf] }
  0x4c   :  { %v3953_v35 = vld [vmem:[#allocation5 + $0x440] sm:$0xf]  ;;  %v5209_v36 = vld [vmem:[#allocation5 + $0x44c] sm:$0xf0]  ;;  %v4354_v38 = vor.u32 %v5309_v31, %v4353_v30  ;;  %1715 = vmatpush.bf16.msrb.mxu0 %v3970_v32  ;;  %1728 = vmatpush.bf16.msrb.mxu1 %v4098_v33  ;;  %v102_v23 = vld [vmem:[#allocation2 + $0x38] sm:$0xff]  ;;  %v3910_v30 = vor.u32 %v5195_v16, %v3907_v17 }
  0x4d   :  { %v4081_v37 = vld [vmem:[#allocation5 + $0x540] sm:$0xf]  ;;  %v5241_v39 = vld [vmem:[#allocation5 + $0x54c] sm:$0xf0]  ;;  %v3954_v44 = vor.u32 %v5209_v36, %v3953_v35  ;;  %1741 = vmatpush.bf16.msrb.mxu2 %v4226_v34  ;;  %v3507_v27 = vld [vmem:[#allocation5 + $0xd0] sm:$0xf0] }
  0x4e   :  { %v4209_v40 = vld [vmem:[#allocation5 + $0x640] sm:$0xf]  ;;  %v5273_v41 = vld [vmem:[#allocation5 + $0x64c] sm:$0xf0]  ;;  %v4082_v45 = vor.u32 %v5241_v39, %v4081_v37  ;;  %1754 = vmatpush.bf16.msrb.mxu3 %v4354_v38  ;;  %v5127_v28 = vld [vmem:[#allocation5 + $0x1c4] sm:$0xf]  ;;  %v5722_v38 = vpack.c.bf16 %v102_v23, %v102_v23  ;;  %v3510_v39 = vor.u32 %v5095_v21, %v3507_v27 }
  0x4f   :  { %v4337_v42 = vld [vmem:[#allocation5 + $0x740] sm:$0xf]  ;;  %v5305_v43 = vld [vmem:[#allocation5 + $0x74c] sm:$0xf0]  ;;  %v4210_v46 = vor.u32 %v5273_v41, %v4209_v40  ;;  %v100_v29 = vld [vmem:[#allocation2 + $0x28] sm:$0xff] }
  0x50   :  { %v3937_v47 = vld [vmem:[#allocation5 + $0x420] sm:$0xf]  ;;  %v5205_v48 = vld [vmem:[#allocation5 + $0x42c] sm:$0xf0]  ;;  %v4338_v50 = vor.u32 %v5305_v43, %v4337_v42  ;;  %1716 = vmatpush.bf16.msrb.mxu0 %v3954_v44  ;;  %1729 = vmatpush.bf16.msrb.mxu1 %v4082_v45  ;;  %v3635_v31 = vld [vmem:[#allocation5 + $0x1d0] sm:$0xf0]  ;;  %v5724_v40 = vpack.c.bf16 %v100_v29, %v100_v29 }
  0x51   :  { %v4065_v49 = vld [vmem:[#allocation5 + $0x520] sm:$0xf]  ;;  %v5237_v51 = vld [vmem:[#allocation5 + $0x52c] sm:$0xf0]  ;;  %v3938_v56 = vor.u32 %v5205_v48, %v3937_v47  ;;  %1742 = vmatpush.bf16.msrb.mxu2 %v4210_v46  ;;  %v5159_v32 = vld [vmem:[#allocation5 + $0x2c4] sm:$0xf]  ;;  %v3638_v41 = vor.u32 %v5127_v28, %v3635_v31 }
  0x52   :  { %v4193_v52 = vld [vmem:[#allocation5 + $0x620] sm:$0xf]  ;;  %v5269_v53 = vld [vmem:[#allocation5 + $0x62c] sm:$0xf0]  ;;  %v4066_v59 = vor.u32 %v5237_v51, %v4065_v49  ;;  %1755 = vmatpush.bf16.msrb.mxu3 %v4338_v50  ;;  %v3763_v33 = vld [vmem:[#allocation5 + $0x2d0] sm:$0xf0] }
  0x53   :  { %v4321_v54 = vld [vmem:[#allocation5 + $0x720] sm:$0xf]  ;;  %v5301_v55 = vld [vmem:[#allocation5 + $0x72c] sm:$0xf0]  ;;  %v4194_v60 = vor.u32 %v5269_v53, %v4193_v52  ;;  %v5191_v35 = vld [vmem:[#allocation5 + $0x3c4] sm:$0xf]  ;;  %v3766_v42 = vor.u32 %v5159_v32, %v3763_v33 }
  0x54   :  { %v3921_v57 = vld [vmem:[#allocation5 + $0x400] sm:$0xf]  ;;  %v5201_v58 = vld [vmem:[#allocation5 + $0x40c] sm:$0xf0]  ;;  %v4322_v0 = vor.u32 %v5301_v55, %v4321_v54  ;;  %1717 = vmatpush.bf16.msrb.mxu0 %v3938_v56  ;;  %1730 = vmatpush.bf16.msrb.mxu1 %v4066_v59  ;;  %v3891_v36 = vld [vmem:[#allocation5 + $0x3d0] sm:$0xf0] }
  0x55   :  { %v4049_v61 = vld [vmem:[#allocation5 + $0x500] sm:$0xf]  ;;  %v5233_v62 = vld [vmem:[#allocation5 + $0x50c] sm:$0xf0]  ;;  %v3922_v7 = vor.u32 %v5201_v58, %v3921_v57  ;;  %1743 = vmatpush.bf16.msrb.mxu2 %v4194_v60  ;;  %v5091_v43 = vld [vmem:[#allocation5 + $0xa4] sm:$0xf]  ;;  %v3894_v46 = vor.u32 %v5191_v35, %v3891_v36 }
  0x56   :  { %v4177_v63 = vld [vmem:[#allocation5 + $0x600] sm:$0xf]  ;;  %v5265_v1 = vld [vmem:[#allocation5 + $0x60c] sm:$0xf0]  ;;  %v4050_v13 = vor.u32 %v5233_v62, %v4049_v61  ;;  %1756 = vmatpush.bf16.msrb.mxu3 %v4322_v0  ;;  %v3491_v44 = vld [vmem:[#allocation5 + $0xb0] sm:$0xf0] }
  0x57   :  { %v4305_v2 = vld [vmem:[#allocation5 + $0x700] sm:$0xf]  ;;  %v5297_v3 = vld [vmem:[#allocation5 + $0x70c] sm:$0xf0]  ;;  %v4178_v14 = vor.u32 %v5265_v1, %v4177_v63  ;;  %v5123_v45 = vld [vmem:[#allocation5 + $0x1a4] sm:$0xf]  ;;  %v3494_v52 = vor.u32 %v5091_v43, %v3491_v44 }
  0x58   :  { %v101_v18 = vld [vmem:[#allocation2 + $0x30] sm:$0xff]  ;;  %v4306_v19 = vor.u32 %v5297_v3, %v4305_v2  ;;  %v99_v22 = vld [vmem:[#allocation2 + $0x20] sm:$0xff]  ;;  %1718 = vmatpush.bf16.msrb.mxu0 %v3922_v7  ;;  %1731 = vmatpush.bf16.msrb.mxu1 %v4050_v13 }
  0x59   :  { %v5718_v34 = vpack.c.bf16 %v101_v18, %v101_v18  ;;  %1744 = vmatpush.bf16.msrb.mxu2 %v4178_v14  ;;  %v5720_v37 = vpack.c.bf16 %v99_v22, %v99_v22  ;;  %v3619_v47 = vld [vmem:[#allocation5 + $0x1b0] sm:$0xf0]  ;;  %v5155_v48 = vld [vmem:[#allocation5 + $0x2a4] sm:$0xf] }
  0x5a   :  { %1757 = vmatpush.bf16.msrb.mxu3 %v4306_v19  ;;  %v3747_v49 = vld [vmem:[#allocation5 + $0x2b0] sm:$0xf0]  ;;  %v5187_v50 = vld [vmem:[#allocation5 + $0x3a4] sm:$0xf]  ;;  %v3622_v53 = vor.u32 %v5123_v45, %v3619_v47 }
  0x5b   :  { %v3875_v51 = vld [vmem:[#allocation5 + $0x3b0] sm:$0xf0]  ;;  %1719 = vmatmul.bf16.vlgmr.msrb.gmra.mxu0 %v5720_v37  ;;  %1732 = vmatmul.bf16.vlgmr.msrb.gmra.mxu1 %v5724_v40  ;;  %v3750_v54 = vor.u32 %v5155_v48, %v3747_v49  ;;  %v5087_v55 = vld [vmem:[#allocation5 + $0x84] sm:$0xf] }
  0x5c   :  { %1763 = vmatpush.bf16.msra.mxu0 %v3526_v20  ;;  %1776 = vmatpush.bf16.msra.mxu1 %v3654_v24  ;;  %v3475_v56 = vld [vmem:[#allocation5 + $0x90] sm:$0xf0]  ;;  %v5119_v57 = vld [vmem:[#allocation5 + $0x184] sm:$0xf]  ;;  %v3878_v58 = vor.u32 %v5187_v50, %v3875_v51 }
  0x5d   :  { %1789 = vmatpush.bf16.msra.mxu2 %v3782_v26  ;;  %1758 = vmatmul.bf16.vlgmr.msrb.gmra.mxu3 %v5722_v38  ;;  %v3603_v59 = vld [vmem:[#allocation5 + $0x190] sm:$0xf0]  ;;  %v5151_v60 = vld [vmem:[#allocation5 + $0x284] sm:$0xf]  ;;  %v3478_v0 = vor.u32 %v5087_v55, %v3475_v56 }
  0x5e   :  { %1802 = vmatpush.bf16.msra.mxu3 %v3910_v30  ;;  %1745 = vmatmul.bf16.vlgmr.msrb.gmra.mxu2 %v5718_v34  ;;  %v3731_v61 = vld [vmem:[#allocation5 + $0x290] sm:$0xf0]  ;;  %v5183_v62 = vld [vmem:[#allocation5 + $0x384] sm:$0xf]  ;;  %v3606_v1 = vor.u32 %v5119_v57, %v3603_v59 }
  0x5f   :  { %v3859_v63 = vld [vmem:[#allocation5 + $0x390] sm:$0xf0]  ;;  %v3734_v2 = vor.u32 %v5151_v60, %v3731_v61  ;;  %v5083_v3 = vld [vmem:[#allocation5 + $0x64] sm:$0xf] }
  0x60   :  { %1764 = vmatpush.bf16.msra.mxu0 %v3510_v39  ;;  %1777 = vmatpush.bf16.msra.mxu1 %v3638_v41  ;;  %v3459_v4 = vld [vmem:[#allocation5 + $0x70] sm:$0xf0]  ;;  %v5115_v5 = vld [vmem:[#allocation5 + $0x164] sm:$0xf]  ;;  %v3862_v6 = vor.u32 %v5183_v62, %v3859_v63 }
  0x61   :  { %1790 = vmatpush.bf16.msra.mxu2 %v3766_v42  ;;  %v3587_v7 = vld [vmem:[#allocation5 + $0x170] sm:$0xf0]  ;;  %v5147_v10 = vld [vmem:[#allocation5 + $0x264] sm:$0xf]  ;;  %v3462_v14 = vor.u32 %v5083_v3, %v3459_v4 }
  0x62   :  { %1803 = vmatpush.bf16.msra.mxu3 %v3894_v46  ;;  %v3715_v11 = vld [vmem:[#allocation5 + $0x270] sm:$0xf0]  ;;  %v5179_v12 = vld [vmem:[#allocation5 + $0x364] sm:$0xf]  ;;  %v3590_v16 = vor.u32 %v5115_v5, %v3587_v7 }
  0x63   :  { %v3843_v13 = vld [vmem:[#allocation5 + $0x370] sm:$0xf0]  ;;  %v3718_v17 = vor.u32 %v5147_v10, %v3715_v11  ;;  %v5079_v18 = vld [vmem:[#allocation5 + $0x44] sm:$0xf] }
  0x64   :  { %1765 = vmatpush.bf16.msra.mxu0 %v3494_v52  ;;  %1778 = vmatpush.bf16.msra.mxu1 %v3622_v53  ;;  %v3443_v19 = vld [vmem:[#allocation5 + $0x50] sm:$0xf0]  ;;  %v5111_v20 = vld [vmem:[#allocation5 + $0x144] sm:$0xf]  ;;  %v3846_v21 = vor.u32 %v5179_v12, %v3843_v13 }
  0x65   :  { %1791 = vmatpush.bf16.msra.mxu2 %v3750_v54  ;;  %v3571_v22 = vld [vmem:[#allocation5 + $0x150] sm:$0xf0]  ;;  %v5143_v23 = vld [vmem:[#allocation5 + $0x244] sm:$0xf]  ;;  %v3446_v28 = vor.u32 %v5079_v18, %v3443_v19 }
  0x66   :  { %1804 = vmatpush.bf16.msra.mxu3 %v3878_v58  ;;  %v3699_v24 = vld [vmem:[#allocation5 + $0x250] sm:$0xf0]  ;;  %v5175_v26 = vld [vmem:[#allocation5 + $0x344] sm:$0xf]  ;;  %v3574_v29 = vor.u32 %v5111_v20, %v3571_v22 }
  0x67   :  { %v3827_v27 = vld [vmem:[#allocation5 + $0x350] sm:$0xf0]  ;;  %v3702_v30 = vor.u32 %v5143_v23, %v3699_v24  ;;  %v5075_v31 = vld [vmem:[#allocation5 + $0x24] sm:$0xf] }
  0x68   :  { %1766 = vmatpush.bf16.msra.mxu0 %v3478_v0  ;;  %1779 = vmatpush.bf16.msra.mxu1 %v3606_v1  ;;  %v3427_v32 = vld [vmem:[#allocation5 + $0x30] sm:$0xf0]  ;;  %v5107_v33 = vld [vmem:[#allocation5 + $0x124] sm:$0xf]  ;;  %v3830_v35 = vor.u32 %v5175_v26, %v3827_v27 }
  0x69   :  { %1792 = vmatpush.bf16.msra.mxu2 %v3734_v2  ;;  %v3555_v36 = vld [vmem:[#allocation5 + $0x130] sm:$0xf0]  ;;  %v5139_v39 = vld [vmem:[#allocation5 + $0x224] sm:$0xf]  ;;  %v3430_v44 = vor.u32 %v5075_v31, %v3427_v32 }
  0x6a   :  { %1805 = vmatpush.bf16.msra.mxu3 %v3862_v6  ;;  %v3683_v41 = vld [vmem:[#allocation5 + $0x230] sm:$0xf0]  ;;  %v5171_v42 = vld [vmem:[#allocation5 + $0x324] sm:$0xf]  ;;  %v3558_v47 = vor.u32 %v5107_v33, %v3555_v36 }
  0x6b   :  { %v3811_v43 = vld [vmem:[#allocation5 + $0x330] sm:$0xf0]  ;;  %v5071_v45 = vld [vmem:[#allocation5 + $0x4] sm:$0xf]  ;;  %v3686_v48 = vor.u32 %v5139_v39, %v3683_v41 }
  0x6c   :  { %1767 = vmatpush.bf16.msra.mxu0 %v3462_v14  ;;  %1780 = vmatpush.bf16.msra.mxu1 %v3590_v16  ;;  %v3411_v46 = vld [vmem:[#allocation5 + $0x10] sm:$0xf0]  ;;  %v5103_v49 = vld [vmem:[#allocation5 + $0x104] sm:$0xf]  ;;  %v3814_v52 = vor.u32 %v5171_v42, %v3811_v43 }
  0x6d   :  { %1793 = vmatpush.bf16.msra.mxu2 %v3718_v17  ;;  %v3539_v50 = vld [vmem:[#allocation5 + $0x110] sm:$0xf0]  ;;  %v5135_v51 = vld [vmem:[#allocation5 + $0x204] sm:$0xf]  ;;  %v3414_v59 = vor.u32 %v5071_v45, %v3411_v46 }
  0x6e   :  { %1806 = vmatpush.bf16.msra.mxu3 %v3846_v21  ;;  %v3667_v53 = vld [vmem:[#allocation5 + $0x210] sm:$0xf0]  ;;  %v5167_v54 = vld [vmem:[#allocation5 + $0x304] sm:$0xf]  ;;  %v3542_v63 = vor.u32 %v5103_v49, %v3539_v50 }
  0x6f   :  { %v3795_v55 = vld [vmem:[#allocation5 + $0x310] sm:$0xf0]  ;;  %v5227_v56 = vld [vmem:[#allocation5 + $0x4e4] sm:$0xf]  ;;  %v3670_v0 = vor.u32 %v5135_v51, %v3667_v53 }
  0x70   :  { %1768 = vmatpush.bf16.msra.mxu0 %v3446_v28  ;;  %1781 = vmatpush.bf16.msra.mxu1 %v3574_v29  ;;  %v4035_v57 = vld [vmem:[#allocation5 + $0x4f0] sm:$0xf0]  ;;  %v5259_v58 = vld [vmem:[#allocation5 + $0x5e4] sm:$0xf]  ;;  %v3798_v3 = vor.u32 %v5167_v54, %v3795_v55 }
  0x71   :  { %1794 = vmatpush.bf16.msra.mxu2 %v3702_v30  ;;  %v4163_v60 = vld [vmem:[#allocation5 + $0x5f0] sm:$0xf0]  ;;  %v5291_v61 = vld [vmem:[#allocation5 + $0x6e4] sm:$0xf]  ;;  %v4038_v4 = vor.u32 %v5227_v56, %v4035_v57 }
  0x72   :  { %1807 = vmatpush.bf16.msra.mxu3 %v3830_v35  ;;  %v4291_v62 = vld [vmem:[#allocation5 + $0x6f0] sm:$0xf0]  ;;  %v5323_v1 = vld [vmem:[#allocation5 + $0x7e4] sm:$0xf]  ;;  %v4166_v5 = vor.u32 %v5259_v58, %v4163_v60 }
  0x73   :  { %v4419_v2 = vld [vmem:[#allocation5 + $0x7f0] sm:$0xf0]  ;;  %v4294_v6 = vor.u32 %v5291_v61, %v4291_v62  ;;  %v5223_v7 = vld [vmem:[#allocation5 + $0x4c4] sm:$0xf] }
  0x74   :  { %1769 = vmatpush.bf16.msra.mxu0 %v3430_v44  ;;  %1782 = vmatpush.bf16.msra.mxu1 %v3558_v47  ;;  %v4019_v10 = vld [vmem:[#allocation5 + $0x4d0] sm:$0xf0]  ;;  %v5255_v11 = vld [vmem:[#allocation5 + $0x5c4] sm:$0xf]  ;;  %v4422_v12 = vor.u32 %v5323_v1, %v4419_v2 }
  0x75   :  { %1795 = vmatpush.bf16.msra.mxu2 %v3686_v48  ;;  %v4147_v13 = vld [vmem:[#allocation5 + $0x5d0] sm:$0xf0]  ;;  %v5287_v14 = vld [vmem:[#allocation5 + $0x6c4] sm:$0xf]  ;;  %v4022_v19 = vor.u32 %v5223_v7, %v4019_v10 }
  0x76   :  { %1808 = vmatpush.bf16.msra.mxu3 %v3814_v52  ;;  %v4275_v16 = vld [vmem:[#allocation5 + $0x6d0] sm:$0xf0]  ;;  %v5319_v17 = vld [vmem:[#allocation5 + $0x7c4] sm:$0xf]  ;;  %v4150_v20 = vor.u32 %v5255_v11, %v4147_v13 }
  0x77   :  { %v4403_v18 = vld [vmem:[#allocation5 + $0x7d0] sm:$0xf0]  ;;  %v4278_v21 = vor.u32 %v5287_v14, %v4275_v16  ;;  %v5219_v22 = vld [vmem:[#allocation5 + $0x4a4] sm:$0xf] }
  0x78   :  { %1770 = vmatpush.bf16.msra.mxu0 %v3414_v59  ;;  %1783 = vmatpush.bf16.msra.mxu1 %v3542_v63  ;;  %v4003_v23 = vld [vmem:[#allocation5 + $0x4b0] sm:$0xf0]  ;;  %v5251_v24 = vld [vmem:[#allocation5 + $0x5a4] sm:$0xf]  ;;  %v4406_v26 = vor.u32 %v5319_v17, %v4403_v18 }
  0x79   :  { %1796 = vmatpush.bf16.msra.mxu2 %v3670_v0  ;;  %v4131_v27 = vld [vmem:[#allocation5 + $0x5b0] sm:$0xf0]  ;;  %v5283_v28 = vld [vmem:[#allocation5 + $0x6a4] sm:$0xf]  ;;  %v4006_v32 = vor.u32 %v5219_v22, %v4003_v23 }
  0x7a   :  { %1809 = vmatpush.bf16.msra.mxu3 %v3798_v3  ;;  %v4259_v29 = vld [vmem:[#allocation5 + $0x6b0] sm:$0xf0]  ;;  %v5315_v30 = vld [vmem:[#allocation5 + $0x7a4] sm:$0xf]  ;;  %v4134_v33 = vor.u32 %v5251_v24, %v4131_v27 }
  0x7b   :  { %v4387_v31 = vld [vmem:[#allocation5 + $0x7b0] sm:$0xf0]  ;;  %1771 = vmatmul.bf16.vlgmr.msra.gmra.mxu0 %v5708_v9  ;;  %1784 = vmatmul.bf16.vlgmr.msra.gmra.mxu1 %v5715_v25  ;;  %v4262_v35 = vor.u32 %v5283_v28, %v4259_v29  ;;  %v5215_v36 = vld [vmem:[#allocation5 + $0x484] sm:$0xf] }
  0x7c   :  { %1815 = vmatpush.bf16.msrb.mxu0 %v4038_v4  ;;  %1828 = vmatpush.bf16.msrb.mxu1 %v4166_v5  ;;  %v3987_v39 = vld [vmem:[#allocation5 + $0x490] sm:$0xf0]  ;;  %v5247_v41 = vld [vmem:[#allocation5 + $0x584] sm:$0xf]  ;;  %v4390_v42 = vor.u32 %v5315_v30, %v4387_v31 }
  0x7d   :  { %1841 = vmatpush.bf16.msrb.mxu2 %v4294_v6  ;;  %1810 = vmatmul.bf16.vlgmr.msra.gmra.mxu3 %v5710_v15  ;;  %v4115_v43 = vld [vmem:[#allocation5 + $0x590] sm:$0xf0]  ;;  %v5279_v44 = vld [vmem:[#allocation5 + $0x684] sm:$0xf]  ;;  %v3990_v48 = vor.u32 %v5215_v36, %v3987_v39  ;;  %v3529_v39 = vld [vmem:[#allocation5 + $0xe8] sm:$0xf] }
  0x7e   :  { %1854 = vmatpush.bf16.msrb.mxu3 %v4422_v12  ;;  %1797 = vmatmul.bf16.vlgmr.msra.gmra.mxu2 %v5706_v8  ;;  %v4243_v45 = vld [vmem:[#allocation5 + $0x690] sm:$0xf0]  ;;  %v5311_v46 = vld [vmem:[#allocation5 + $0x784] sm:$0xf]  ;;  %v4118_v49 = vor.u32 %v5247_v41, %v4115_v43  ;;  %v5102_v41 = vld [vmem:[#allocation5 + $0xf4] sm:$0xf0] }
  0x7f   :  { %v4371_v47 = vld [vmem:[#allocation5 + $0x790] sm:$0xf0]  ;;  %v4246_v50 = vor.u32 %v5279_v44, %v4243_v45  ;;  %v5211_v51 = vld [vmem:[#allocation5 + $0x464] sm:$0xf]  ;;  %v5134_v44 = vld [vmem:[#allocation5 + $0x1f4] sm:$0xf0] }
  0x80   :  { %1816 = vmatpush.bf16.msrb.mxu0 %v4022_v19  ;;  %1829 = vmatpush.bf16.msrb.mxu1 %v4150_v20  ;;  %v3971_v52 = vld [vmem:[#allocation5 + $0x470] sm:$0xf0]  ;;  %v5243_v53 = vld [vmem:[#allocation5 + $0x564] sm:$0xf]  ;;  %v4374_v54 = vor.u32 %v5311_v46, %v4371_v47  ;;  %v3785_v45 = vld [vmem:[#allocation5 + $0x2e8] sm:$0xf] }
  0x81   :  { %1842 = vmatpush.bf16.msrb.mxu2 %v4278_v21  ;;  %v4099_v55 = vld [vmem:[#allocation5 + $0x570] sm:$0xf0]  ;;  %v5275_v56 = vld [vmem:[#allocation5 + $0x664] sm:$0xf]  ;;  %v3974_v60 = vor.u32 %v5211_v51, %v3971_v52  ;;  %v5166_v46 = vld [vmem:[#allocation5 + $0x2f4] sm:$0xf0]  ;;  %v3530_v52 = vor.u32 %v5102_v41, %v3529_v39 }
  0x82   :  { %1855 = vmatpush.bf16.msrb.mxu3 %v4406_v26  ;;  %v4227_v57 = vld [vmem:[#allocation5 + $0x670] sm:$0xf0]  ;;  %v5307_v58 = vld [vmem:[#allocation5 + $0x764] sm:$0xf]  ;;  %v4102_v61 = vor.u32 %v5243_v53, %v4099_v55  ;;  %v3513_v55 = vld [vmem:[#allocation5 + $0xc8] sm:$0xf] }
  0x83   :  { %v4355_v59 = vld [vmem:[#allocation5 + $0x770] sm:$0xf0]  ;;  %v4230_v62 = vor.u32 %v5275_v56, %v4227_v57  ;;  %v5207_v63 = vld [vmem:[#allocation5 + $0x444] sm:$0xf]  ;;  %v5098_v56 = vld [vmem:[#allocation5 + $0xd4] sm:$0xf0] }
  0x84   :  { %1817 = vmatpush.bf16.msrb.mxu0 %v4006_v32  ;;  %1830 = vmatpush.bf16.msrb.mxu1 %v4134_v33  ;;  %v3955_v0 = vld [vmem:[#allocation5 + $0x450] sm:$0xf0]  ;;  %v5239_v1 = vld [vmem:[#allocation5 + $0x544] sm:$0xf]  ;;  %v4358_v2 = vor.u32 %v5307_v58, %v4355_v59  ;;  %v3641_v57 = vld [vmem:[#allocation5 + $0x1c8] sm:$0xf] }
  0x85   :  { %1843 = vmatpush.bf16.msrb.mxu2 %v4262_v35  ;;  %v4083_v3 = vld [vmem:[#allocation5 + $0x550] sm:$0xf0]  ;;  %v5271_v4 = vld [vmem:[#allocation5 + $0x644] sm:$0xf]  ;;  %v3958_v10 = vor.u32 %v5207_v63, %v3955_v0  ;;  %v5130_v59 = vld [vmem:[#allocation5 + $0x1d4] sm:$0xf0]  ;;  %v3514_v0 = vor.u32 %v5098_v56, %v3513_v55 }
  0x86   :  { %1856 = vmatpush.bf16.msrb.mxu3 %v4390_v42  ;;  %v4211_v5 = vld [vmem:[#allocation5 + $0x650] sm:$0xf0]  ;;  %v5303_v6 = vld [vmem:[#allocation5 + $0x744] sm:$0xf]  ;;  %v4086_v11 = vor.u32 %v5239_v1, %v4083_v3  ;;  %v3657_v42 = vld [vmem:[#allocation5 + $0x1e8] sm:$0xf]  ;;  %v3642_v1 = vor.u32 %v5130_v59, %v3641_v57 }
  0x87   :  { %v4339_v7 = vld [vmem:[#allocation5 + $0x750] sm:$0xf0]  ;;  %v4214_v12 = vor.u32 %v5271_v4, %v4211_v5  ;;  %v5203_v13 = vld [vmem:[#allocation5 + $0x424] sm:$0xf]  ;;  %v3658_v53 = vor.u32 %v5134_v44, %v3657_v42  ;;  %v5194_v63 = vld [vmem:[#allocation5 + $0x3d4] sm:$0xf0] }
  0x88   :  { %1818 = vmatpush.bf16.msrb.mxu0 %v3990_v48  ;;  %1831 = vmatpush.bf16.msrb.mxu1 %v4118_v49  ;;  %v3939_v14 = vld [vmem:[#allocation5 + $0x430] sm:$0xf0]  ;;  %v5235_v16 = vld [vmem:[#allocation5 + $0x524] sm:$0xf]  ;;  %v4342_v17 = vor.u32 %v5303_v6, %v4339_v7  ;;  %v3913_v49 = vld [vmem:[#allocation5 + $0x3e8] sm:$0xf] }
  0x89   :  { %1844 = vmatpush.bf16.msrb.mxu2 %v4246_v50  ;;  %v4067_v18 = vld [vmem:[#allocation5 + $0x530] sm:$0xf0]  ;;  %v5267_v19 = vld [vmem:[#allocation5 + $0x624] sm:$0xf]  ;;  %v3942_v23 = vor.u32 %v5203_v13, %v3939_v14  ;;  %v5198_v50 = vld [vmem:[#allocation5 + $0x3f4] sm:$0xf0] }
  0x8a   :  { %1857 = vmatpush.bf16.msrb.mxu3 %v4374_v54  ;;  %v4195_v20 = vld [vmem:[#allocation5 + $0x630] sm:$0xf0]  ;;  %v5299_v21 = vld [vmem:[#allocation5 + $0x724] sm:$0xf]  ;;  %v4070_v27 = vor.u32 %v5235_v16, %v4067_v18  ;;  %v3786_v54 = vor.u32 %v5166_v46, %v3785_v45  ;;  %v3914_v58 = vor.u32 %v5198_v50, %v3913_v49  ;;  %v3497_v3 = vld [vmem:[#allocation5 + $0xa8] sm:$0xf] }
  0x8b   :  { %v4323_v22 = vld [vmem:[#allocation5 + $0x730] sm:$0xf0]  ;;  %v5199_v24 = vld [vmem:[#allocation5 + $0x404] sm:$0xf]  ;;  %v4198_v28 = vor.u32 %v5267_v19, %v4195_v20  ;;  %v5094_v4 = vld [vmem:[#allocation5 + $0xb4] sm:$0xf0] }
  0x8c   :  { %1819 = vmatpush.bf16.msrb.mxu0 %v3974_v60  ;;  %1832 = vmatpush.bf16.msrb.mxu1 %v4102_v61  ;;  %v3923_v26 = vld [vmem:[#allocation5 + $0x410] sm:$0xf0]  ;;  %v5231_v29 = vld [vmem:[#allocation5 + $0x504] sm:$0xf]  ;;  %v4326_v32 = vor.u32 %v5299_v21, %v4323_v22  ;;  %v3769_v60 = vld [vmem:[#allocation5 + $0x2c8] sm:$0xf]  ;;  %v3498_v14 = vor.u32 %v5094_v4, %v3497_v3 }
  0x8d   :  { %1845 = vmatpush.bf16.msrb.mxu2 %v4230_v62  ;;  %v4051_v30 = vld [vmem:[#allocation5 + $0x510] sm:$0xf0]  ;;  %v5263_v31 = vld [vmem:[#allocation5 + $0x604] sm:$0xf]  ;;  %v3926_v43 = vor.u32 %v5199_v24, %v3923_v26  ;;  %v5162_v61 = vld [vmem:[#allocation5 + $0x2d4] sm:$0xf0] }
  0x8e   :  { %1858 = vmatpush.bf16.msrb.mxu3 %v4358_v2  ;;  %v4179_v33 = vld [vmem:[#allocation5 + $0x610] sm:$0xf0]  ;;  %v5295_v35 = vld [vmem:[#allocation5 + $0x704] sm:$0xf]  ;;  %v4054_v47 = vor.u32 %v5231_v29, %v4051_v30  ;;  %v3897_v62 = vld [vmem:[#allocation5 + $0x3c8] sm:$0xf]  ;;  %v3770_v2 = vor.u32 %v5162_v61, %v3769_v60 }
  0x8f   :  { %v4307_v36 = vld [vmem:[#allocation5 + $0x710] sm:$0xf0]  ;;  %v4182_v48 = vor.u32 %v5263_v31, %v4179_v33  ;;  %v3625_v5 = vld [vmem:[#allocation5 + $0x1a8] sm:$0xf]  ;;  %v3898_v6 = vor.u32 %v5194_v63, %v3897_v62  ;;  %v5126_v7 = vld [vmem:[#allocation5 + $0x1b4] sm:$0xf0] }
  0x90   :  { %1820 = vmatpush.bf16.msrb.mxu0 %v3958_v10  ;;  %1833 = vmatpush.bf16.msrb.mxu1 %v4086_v11  ;;  %v4310_v51 = vor.u32 %v5295_v35, %v4307_v36  ;;  %v3753_v10 = vld [vmem:[#allocation5 + $0x2a8] sm:$0xf]  ;;  %v5158_v11 = vld [vmem:[#allocation5 + $0x2b4] sm:$0xf0]  ;;  %v3626_v16 = vor.u32 %v5126_v7, %v3625_v5 }
  0x91   :  { %1846 = vmatpush.bf16.msrb.mxu2 %v4214_v12  ;;  %v3881_v12 = vld [vmem:[#allocation5 + $0x3a8] sm:$0xf]  ;;  %v5190_v13 = vld [vmem:[#allocation5 + $0x3b4] sm:$0xf0] }
  0x92   :  { %1859 = vmatpush.bf16.msrb.mxu3 %v4342_v17  ;;  %v3754_v17 = vor.u32 %v5158_v11, %v3753_v10  ;;  %v3481_v18 = vld [vmem:[#allocation5 + $0x88] sm:$0xf]  ;;  %v5090_v19 = vld [vmem:[#allocation5 + $0x94] sm:$0xf0]  ;;  %v3882_v21 = vor.u32 %v5190_v13, %v3881_v12 }
  0x93   :  { %v3609_v20 = vld [vmem:[#allocation5 + $0x188] sm:$0xf]  ;;  %v5122_v22 = vld [vmem:[#allocation5 + $0x194] sm:$0xf0] }
  0x94   :  { %1821 = vmatpush.bf16.msrb.mxu0 %v3942_v23  ;;  %1834 = vmatpush.bf16.msrb.mxu1 %v4070_v27  ;;  %v3737_v23 = vld [vmem:[#allocation5 + $0x288] sm:$0xf]  ;;  %v5154_v24 = vld [vmem:[#allocation5 + $0x294] sm:$0xf0]  ;;  %v3610_v29 = vor.u32 %v5122_v22, %v3609_v20 }
  0x95   :  { %1847 = vmatpush.bf16.msrb.mxu2 %v4198_v28  ;;  %v3865_v26 = vld [vmem:[#allocation5 + $0x388] sm:$0xf]  ;;  %v5186_v27 = vld [vmem:[#allocation5 + $0x394] sm:$0xf0]  ;;  %v3482_v28 = vor.u32 %v5090_v19, %v3481_v18  ;;  %v3738_v30 = vor.u32 %v5154_v24, %v3737_v23 }
  0x96   :  { %1860 = vmatpush.bf16.msrb.mxu3 %v4326_v32  ;;  %v3465_v31 = vld [vmem:[#allocation5 + $0x68] sm:$0xf]  ;;  %v5086_v32 = vld [vmem:[#allocation5 + $0x74] sm:$0xf0]  ;;  %v3866_v35 = vor.u32 %v5186_v27, %v3865_v26 }
  0x97   :  { %v3593_v33 = vld [vmem:[#allocation5 + $0x168] sm:$0xf]  ;;  %v5118_v36 = vld [vmem:[#allocation5 + $0x174] sm:$0xf0]  ;;  %v3466_v44 = vor.u32 %v5086_v32, %v3465_v31 }
  0x98   :  { %1822 = vmatpush.bf16.msrb.mxu0 %v3926_v43  ;;  %1835 = vmatpush.bf16.msrb.mxu1 %v4054_v47  ;;  %v3721_v39 = vld [vmem:[#allocation5 + $0x268] sm:$0xf]  ;;  %v5150_v41 = vld [vmem:[#allocation5 + $0x274] sm:$0xf0]  ;;  %v3594_v45 = vor.u32 %v5118_v36, %v3593_v33 }
  0x99   :  { %1848 = vmatpush.bf16.msrb.mxu2 %v4182_v48  ;;  %v3849_v42 = vld [vmem:[#allocation5 + $0x368] sm:$0xf]  ;;  %v5182_v43 = vld [vmem:[#allocation5 + $0x374] sm:$0xf0]  ;;  %v3722_v46 = vor.u32 %v5150_v41, %v3721_v39 }
  0x9a   :  { %1861 = vmatpush.bf16.msrb.mxu3 %v4310_v51  ;;  %v3449_v47 = vld [vmem:[#allocation5 + $0x48] sm:$0xf]  ;;  %v5082_v48 = vld [vmem:[#allocation5 + $0x54] sm:$0xf0]  ;;  %v3850_v50 = vor.u32 %v5182_v43, %v3849_v42 }
  0x9b   :  { %1823 = vmatmul.bf16.vlgmr.msrb.gmra.mxu0 %v5720_v37  ;;  %1836 = vmatmul.bf16.vlgmr.msrb.gmra.mxu1 %v5724_v40  ;;  %v3577_v49 = vld [vmem:[#allocation5 + $0x148] sm:$0xf]  ;;  %v5114_v51 = vld [vmem:[#allocation5 + $0x154] sm:$0xf0]  ;;  %v3450_v56 = vor.u32 %v5082_v48, %v3449_v47 }
  0x9c   :  { %1867 = vmatpush.bf16.msra.mxu0 %v3530_v52  ;;  %1880 = vmatpush.bf16.msra.mxu1 %v3658_v53  ;;  %v3705_v52 = vld [vmem:[#allocation5 + $0x248] sm:$0xf]  ;;  %v5146_v53 = vld [vmem:[#allocation5 + $0x254] sm:$0xf0]  ;;  %v3578_v57 = vor.u32 %v5114_v51, %v3577_v49 }
  0x9d   :  { %1893 = vmatpush.bf16.msra.mxu2 %v3786_v54  ;;  %1862 = vmatmul.bf16.vlgmr.msrb.gmra.mxu3 %v5722_v38  ;;  %v3833_v54 = vld [vmem:[#allocation5 + $0x348] sm:$0xf]  ;;  %v5178_v55 = vld [vmem:[#allocation5 + $0x354] sm:$0xf0] }
  0x9e   :  { %1906 = vmatpush.bf16.msra.mxu3 %v3914_v58  ;;  %1849 = vmatmul.bf16.vlgmr.msrb.gmra.mxu2 %v5718_v34  ;;  %v3706_v58 = vor.u32 %v5146_v53, %v3705_v52  ;;  %v3433_v59 = vld [vmem:[#allocation5 + $0x28] sm:$0xf]  ;;  %v5078_v60 = vld [vmem:[#allocation5 + $0x34] sm:$0xf0]  ;;  %v3834_v62 = vor.u32 %v5178_v55, %v3833_v54 }
  0x9f   :  { %v3561_v61 = vld [vmem:[#allocation5 + $0x128] sm:$0xf]  ;;  %v5110_v63 = vld [vmem:[#allocation5 + $0x134] sm:$0xf0]  ;;  %v3434_v4 = vor.u32 %v5078_v60, %v3433_v59 }
  0xa0   :  { %1868 = vmatpush.bf16.msra.mxu0 %v3514_v0  ;;  %1881 = vmatpush.bf16.msra.mxu1 %v3642_v1  ;;  %v3689_v0 = vld [vmem:[#allocation5 + $0x228] sm:$0xf]  ;;  %v5142_v1 = vld [vmem:[#allocation5 + $0x234] sm:$0xf0]  ;;  %v3562_v7 = vor.u32 %v5110_v63, %v3561_v61 }
  0xa1   :  { %1894 = vmatpush.bf16.msra.mxu2 %v3770_v2  ;;  %v3817_v2 = vld [vmem:[#allocation5 + $0x328] sm:$0xf]  ;;  %v5174_v3 = vld [vmem:[#allocation5 + $0x334] sm:$0xf0]  ;;  %v3690_v10 = vor.u32 %v5142_v1, %v3689_v0 }
  0xa2   :  { %1907 = vmatpush.bf16.msra.mxu3 %v3898_v6  ;;  %v3417_v5 = vld [vmem:[#allocation5 + $0x8] sm:$0xf]  ;;  %v5074_v6 = vld [vmem:[#allocation5 + $0x14] sm:$0xf0] }
  0xa3   :  { %v3545_v11 = vld [vmem:[#allocation5 + $0x108] sm:$0xf]  ;;  %v5106_v12 = vld [vmem:[#allocation5 + $0x114] sm:$0xf0]  ;;  %v3418_v22 = vor.u32 %v5074_v6, %v3417_v5  ;;  %v5742_v6 = vld [vmem:[#allocation10] sm:$0xf] }
  0xa4   :  { %1869 = vmatpush.bf16.msra.mxu0 %v3498_v14  ;;  %1882 = vmatpush.bf16.msra.mxu1 %v3626_v16  ;;  %v3673_v13 = vld [vmem:[#allocation5 + $0x208] sm:$0xf]  ;;  %v3818_v14 = vor.u32 %v5174_v3, %v3817_v2  ;;  %v5138_v16 = vld [vmem:[#allocation5 + $0x214] sm:$0xf0]  ;;  %v3546_v27 = vor.u32 %v5106_v12, %v3545_v11 }
  0xa5   :  { %1895 = vmatpush.bf16.msra.mxu2 %v3754_v17  ;;  %v3801_v17 = vld [vmem:[#allocation5 + $0x308] sm:$0xf]  ;;  %v5170_v18 = vld [vmem:[#allocation5 + $0x314] sm:$0xf0] }
  0xa6   :  { %1908 = vmatpush.bf16.msra.mxu3 %v3882_v21  ;;  %v4041_v19 = vld [vmem:[#allocation5 + $0x4e8] sm:$0xf]  ;;  %v5230_v20 = vld [vmem:[#allocation5 + $0x4f4] sm:$0xf0]  ;;  %v3802_v31 = vor.u32 %v5170_v18, %v3801_v17  ;;  %v371_v18 = vperm.slane %v5742_v6, 0 }
  0xa7   :  { %v4169_v21 = vld [vmem:[#allocation5 + $0x5e8] sm:$0xf]  ;;  %v5262_v23 = vld [vmem:[#allocation5 + $0x5f4] sm:$0xf0]  ;;  %v4042_v32 = vor.u32 %v5230_v20, %v4041_v19 }
  0xa8   :  { %1870 = vmatpush.bf16.msra.mxu0 %v3482_v28  ;;  %1883 = vmatpush.bf16.msra.mxu1 %v3610_v29  ;;  %v4297_v24 = vld [vmem:[#allocation5 + $0x6e8] sm:$0xf]  ;;  %v5294_v26 = vld [vmem:[#allocation5 + $0x6f4] sm:$0xf0]  ;;  %v3674_v28 = vor.u32 %v5138_v16, %v3673_v13  ;;  %v4170_v33 = vor.u32 %v5262_v23, %v4169_v21 }
  0xa9   :  { %1896 = vmatpush.bf16.msra.mxu2 %v3738_v30  ;;  %v4425_v29 = vld [vmem:[#allocation5 + $0x7e8] sm:$0xf]  ;;  %v5326_v30 = vld [vmem:[#allocation5 + $0x7f4] sm:$0xf0] }
  0xaa   :  { %1909 = vmatpush.bf16.msra.mxu3 %v3866_v35  ;;  %v4298_v35 = vor.u32 %v5294_v26, %v4297_v24  ;;  %v4025_v36 = vld [vmem:[#allocation5 + $0x4c8] sm:$0xf]  ;;  %v5226_v39 = vld [vmem:[#allocation5 + $0x4d4] sm:$0xf0]  ;;  %v4426_v42 = vor.u32 %v5326_v30, %v4425_v29 }
  0xab   :  { %v4153_v41 = vld [vmem:[#allocation5 + $0x5c8] sm:$0xf]  ;;  %v5258_v43 = vld [vmem:[#allocation5 + $0x5d4] sm:$0xf0]  ;;  %v4026_v48 = vor.u32 %v5226_v39, %v4025_v36 }
  0xac   :  { %1871 = vmatpush.bf16.msra.mxu0 %v3466_v44  ;;  %1884 = vmatpush.bf16.msra.mxu1 %v3594_v45  ;;  %v4281_v44 = vld [vmem:[#allocation5 + $0x6c8] sm:$0xf]  ;;  %v5290_v45 = vld [vmem:[#allocation5 + $0x6d4] sm:$0xf0]  ;;  %v4154_v49 = vor.u32 %v5258_v43, %v4153_v41 }
  0xad   :  { %1897 = vmatpush.bf16.msra.mxu2 %v3722_v46  ;;  %v4409_v46 = vld [vmem:[#allocation5 + $0x7c8] sm:$0xf]  ;;  %v5322_v47 = vld [vmem:[#allocation5 + $0x7d4] sm:$0xf0] }
  0xae   :  { %1910 = vmatpush.bf16.msra.mxu3 %v3850_v50  ;;  %v4282_v50 = vor.u32 %v5290_v45, %v4281_v44  ;;  %v4009_v51 = vld [vmem:[#allocation5 + $0x4a8] sm:$0xf]  ;;  %v5222_v52 = vld [vmem:[#allocation5 + $0x4b4] sm:$0xf0]  ;;  %v4410_v54 = vor.u32 %v5322_v47, %v4409_v46 }
  0xaf   :  { %v4137_v53 = vld [vmem:[#allocation5 + $0x5a8] sm:$0xf]  ;;  %v5254_v55 = vld [vmem:[#allocation5 + $0x5b4] sm:$0xf0]  ;;  %v4010_v60 = vor.u32 %v5222_v52, %v4009_v51 }
  0xb0   :  { %1872 = vmatpush.bf16.msra.mxu0 %v3450_v56  ;;  %1885 = vmatpush.bf16.msra.mxu1 %v3578_v57  ;;  %v4265_v56 = vld [vmem:[#allocation5 + $0x6a8] sm:$0xf]  ;;  %v5286_v57 = vld [vmem:[#allocation5 + $0x6b4] sm:$0xf0] }
  0xb1   :  { %1898 = vmatpush.bf16.msra.mxu2 %v3706_v58  ;;  %v4393_v58 = vld [vmem:[#allocation5 + $0x7a8] sm:$0xf]  ;;  %v5318_v59 = vld [vmem:[#allocation5 + $0x7b4] sm:$0xf0]  ;;  %v4266_v63 = vor.u32 %v5286_v57, %v4265_v56 }
  0xb2   :  { %1911 = vmatpush.bf16.msra.mxu3 %v3834_v62  ;;  %v3993_v61 = vld [vmem:[#allocation5 + $0x488] sm:$0xf]  ;;  %v4138_v62 = vor.u32 %v5254_v55, %v4137_v53  ;;  %v5218_v0 = vld [vmem:[#allocation5 + $0x494] sm:$0xf0]  ;;  %v4394_v3 = vor.u32 %v5318_v59, %v4393_v58 }
  0xb3   :  { %v4121_v1 = vld [vmem:[#allocation5 + $0x588] sm:$0xf]  ;;  %v5250_v2 = vld [vmem:[#allocation5 + $0x594] sm:$0xf0]  ;;  %v3994_v11 = vor.u32 %v5218_v0, %v3993_v61 }
  0xb4   :  { %1873 = vmatpush.bf16.msra.mxu0 %v3434_v4  ;;  %1886 = vmatpush.bf16.msra.mxu1 %v3562_v7  ;;  %v4249_v4 = vld [vmem:[#allocation5 + $0x688] sm:$0xf]  ;;  %v5282_v5 = vld [vmem:[#allocation5 + $0x694] sm:$0xf0]  ;;  %v4122_v13 = vor.u32 %v5250_v2, %v4121_v1 }
  0xb5   :  { %1899 = vmatpush.bf16.msra.mxu2 %v3690_v10  ;;  %v4377_v7 = vld [vmem:[#allocation5 + $0x788] sm:$0xf]  ;;  %v5314_v10 = vld [vmem:[#allocation5 + $0x794] sm:$0xf0] }
  0xb6   :  { %1912 = vmatpush.bf16.msra.mxu3 %v3818_v14  ;;  %v3977_v12 = vld [vmem:[#allocation5 + $0x468] sm:$0xf]  ;;  %v4250_v14 = vor.u32 %v5282_v5, %v4249_v4  ;;  %v5214_v16 = vld [vmem:[#allocation5 + $0x474] sm:$0xf0]  ;;  %v4378_v19 = vor.u32 %v5314_v10, %v4377_v7 }
  0xb7   :  { %v4105_v17 = vld [vmem:[#allocation5 + $0x568] sm:$0xf]  ;;  %v5246_v20 = vld [vmem:[#allocation5 + $0x574] sm:$0xf0]  ;;  %v3978_v26 = vor.u32 %v5214_v16, %v3977_v12  ;;  %v1681_v45 = vpop.f32.mrf.mxu1  ;;  %v3531_v16 = vld [vmem:[#allocation5 + $0xf8] sm:$0xf0] }
  0xb8   :  { %1874 = vmatpush.bf16.msra.mxu0 %v3418_v22  ;;  %1887 = vmatpush.bf16.msra.mxu1 %v3546_v27  ;;  %v4233_v21 = vld [vmem:[#allocation5 + $0x668] sm:$0xf]  ;;  %v5278_v22 = vld [vmem:[#allocation5 + $0x674] sm:$0xf0] }
  0xb9   :  { %1900 = vmatpush.bf16.msra.mxu2 %v3674_v28  ;;  %v4361_v23 = vld [vmem:[#allocation5 + $0x768] sm:$0xf]  ;;  %v5310_v24 = vld [vmem:[#allocation5 + $0x774] sm:$0xf0]  ;;  %v4106_v28 = vor.u32 %v5246_v20, %v4105_v17  ;;  %v4234_v29 = vor.u32 %v5278_v22, %v4233_v21  ;;  %v5132_v17 = vld [vmem:[#allocation5 + $0x1ec] sm:$0xf] }
  0xba   :  { %1913 = vmatpush.bf16.msra.mxu3 %v3802_v31  ;;  %v3961_v30 = vld [vmem:[#allocation5 + $0x448] sm:$0xf]  ;;  %v5210_v31 = vld [vmem:[#allocation5 + $0x454] sm:$0xf0]  ;;  %v5164_v20 = vld [vmem:[#allocation5 + $0x2ec] sm:$0xf] }
  0xbb   :  { %1875 = vmatmul.bf16.vlgmr.msra.gmra.mxu0 %v5708_v9  ;;  %1888 = vmatmul.bf16.vlgmr.msra.gmra.mxu1 %v5715_v25  ;;  %v5242_v36 = vld [vmem:[#allocation5 + $0x554] sm:$0xf0]  ;;  %v4217_v39 = vld [vmem:[#allocation5 + $0x648] sm:$0xf]  ;;  %v3962_v44 = vor.u32 %v5210_v31, %v3961_v30  ;;  %v3787_v21 = vld [vmem:[#allocation5 + $0x2f8] sm:$0xf0] }
  0xbc   :  { %1919 = vmatpush.bf16.msrb.mxu0 %v4042_v32  ;;  %1932 = vmatpush.bf16.msrb.mxu1 %v4170_v33  ;;  %v4089_v32 = vld [vmem:[#allocation5 + $0x548] sm:$0xf]  ;;  %v5274_v41 = vld [vmem:[#allocation5 + $0x654] sm:$0xf0] }
  0xbd   :  { %1945 = vmatpush.bf16.msrb.mxu2 %v4298_v35  ;;  %1914 = vmatmul.bf16.vlgmr.msra.gmra.mxu3 %v5710_v15  ;;  %v4362_v35 = vor.u32 %v5310_v24, %v4361_v23  ;;  %v5306_v43 = vld [vmem:[#allocation5 + $0x754] sm:$0xf0]  ;;  %v4090_v46 = vor.u32 %v5242_v36, %v4089_v32  ;;  %v4218_v47 = vor.u32 %v5274_v41, %v4217_v39  ;;  %v4329_v57 = vld [vmem:[#allocation5 + $0x728] sm:$0xf]  ;;  %v5128_v36 = vld [vmem:[#allocation5 + $0x1cc] sm:$0xf] }
  0xbe   :  { %1958 = vmatpush.bf16.msrb.mxu3 %v4426_v42  ;;  %1901 = vmatmul.bf16.vlgmr.msra.gmra.mxu2 %v5706_v8  ;;  %v4345_v42 = vld [vmem:[#allocation5 + $0x748] sm:$0xf]  ;;  %v5238_v53 = vld [vmem:[#allocation5 + $0x534] sm:$0xf0]  ;;  %v3790_v32 = vor.u32 %v5164_v20, %v3787_v21 }
  0xbf   :  { %v4346_v52 = vor.u32 %v5306_v43, %v4345_v42  ;;  %v5270_v55 = vld [vmem:[#allocation5 + $0x634] sm:$0xf0]  ;;  %v4185_v5 = vld [vmem:[#allocation5 + $0x608] sm:$0xf]  ;;  %v1683_v22 = vpop.f32.mrf.mxu1  ;;  %v3643_v42 = vld [vmem:[#allocation5 + $0x1d8] sm:$0xf0] }
  0xc0   :  { %1920 = vmatpush.bf16.msrb.mxu0 %v4026_v48  ;;  %1933 = vmatpush.bf16.msrb.mxu1 %v4154_v49  ;;  %v3945_v48 = vld [vmem:[#allocation5 + $0x428] sm:$0xf]  ;;  %v5206_v49 = vld [vmem:[#allocation5 + $0x434] sm:$0xf0]  ;;  %v5160_v43 = vld [vmem:[#allocation5 + $0x2cc] sm:$0xf] }
  0xc1   :  { %1946 = vmatpush.bf16.msrb.mxu2 %v4282_v50  ;;  %v4073_v50 = vld [vmem:[#allocation5 + $0x528] sm:$0xf]  ;;  %v5302_v58 = vld [vmem:[#allocation5 + $0x734] sm:$0xf0]  ;;  %v3946_v61 = vor.u32 %v5206_v49, %v3945_v48  ;;  %v3646_v48 = vor.u32 %v5128_v36, %v3643_v42  ;;  %v3595_v22 = vld [vmem:[#allocation5 + $0x178] sm:$0xf0] }
  0xc2   :  { %1959 = vmatpush.bf16.msrb.mxu3 %v4410_v54  ;;  %v4201_v54 = vld [vmem:[#allocation5 + $0x628] sm:$0xf]  ;;  %v4074_v1 = vor.u32 %v5238_v53, %v4073_v50  ;;  %v5234_v4 = vld [vmem:[#allocation5 + $0x514] sm:$0xf0]  ;;  %v4330_v10 = vor.u32 %v5302_v58, %v4329_v57  ;;  %v5092_v50 = vld [vmem:[#allocation5 + $0xac] sm:$0xf] }
  0xc3   :  { %v4202_v2 = vor.u32 %v5270_v55, %v4201_v54  ;;  %v4313_v12 = vld [vmem:[#allocation5 + $0x708] sm:$0xf]  ;;  %v3627_v54 = vld [vmem:[#allocation5 + $0x1b8] sm:$0xf0]  ;;  %v5156_v55 = vld [vmem:[#allocation5 + $0x2ac] sm:$0xf] }
  0xc4   :  { %1921 = vmatpush.bf16.msrb.mxu0 %v4010_v60  ;;  %1934 = vmatpush.bf16.msrb.mxu1 %v4138_v62  ;;  %v1668_v27 = vpop.f32.mrf.mxu0  ;;  %v1707_v60 = vpop.f32.mrf.mxu3  ;;  %v3929_v62 = vld [vmem:[#allocation5 + $0x408] sm:$0xf]  ;;  %v5188_v57 = vld [vmem:[#allocation5 + $0x3ac] sm:$0xf]  ;;  %v3883_v58 = vld [vmem:[#allocation5 + $0x3b8] sm:$0xf0] }
  0xc5   :  { %1947 = vmatpush.bf16.msrb.mxu2 %v4266_v63  ;;  %v1669_v33 = vadd.f32 %v1668_v27, %v371_v18  ;;  %v5202_v63 = vld [vmem:[#allocation5 + $0x414] sm:$0xf0]  ;;  %v3915_v27 = vld [vmem:[#allocation5 + $0x3f8] sm:$0xf0] }
  0xc6   :  { %1960 = vmatpush.bf16.msrb.mxu3 %v4394_v3  ;;  %v4057_v3 = vld [vmem:[#allocation5 + $0x508] sm:$0xf]  ;;  %v3930_v18 = vor.u32 %v5202_v63, %v3929_v62  ;;  %v5088_v62 = vld [vmem:[#allocation5 + $0x8c] sm:$0xf]  ;;  %v3483_v63 = vld [vmem:[#allocation5 + $0x98] sm:$0xf0] }
  0xc7   :  { %v1682_v51 = vadd.f32 %v1681_v45, %v1669_v33  ;;  %v4058_v23 = vor.u32 %v5234_v4, %v4057_v3  ;;  %v5096_v33 = vld [vmem:[#allocation5 + $0xcc] sm:$0xf]  ;;  %v3739_v4 = vld [vmem:[#allocation5 + $0x298] sm:$0xf0] }
  0xc8   :  { %1922 = vmatpush.bf16.msrb.mxu0 %v3994_v11  ;;  %1935 = vmatpush.bf16.msrb.mxu1 %v4122_v13  ;;  %v5266_v11 = vld [vmem:[#allocation5 + $0x614] sm:$0xf0]  ;;  %v5192_v45 = vld [vmem:[#allocation5 + $0x3cc] sm:$0xf]  ;;  %v3707_v42 = vld [vmem:[#allocation5 + $0x258] sm:$0xf0] }
  0xc9   :  { %1948 = vmatpush.bf16.msrb.mxu2 %v4250_v14  ;;  %v1694_v56 = vpop.f32.mrf.mxu2  ;;  %v5298_v13 = vld [vmem:[#allocation5 + $0x714] sm:$0xf0]  ;;  %v5100_v14 = vld [vmem:[#allocation5 + $0xec] sm:$0xf]  ;;  %v4186_v24 = vor.u32 %v5266_v11, %v4185_v5  ;;  %v3486_v11 = vor.u32 %v5088_v62, %v3483_v63 }
  0xca   :  { %1961 = vmatpush.bf16.msrb.mxu3 %v4378_v19  ;;  %v1695_v59 = vadd.f32 %v1694_v56, %v1682_v51  ;;  %v3659_v19 = vld [vmem:[#allocation5 + $0x1f8] sm:$0xf0]  ;;  %v5152_v3 = vld [vmem:[#allocation5 + $0x28c] sm:$0xf] }
  0xcb   :  { %v3662_v31 = vor.u32 %v5132_v17, %v3659_v19  ;;  %v3499_v51 = vld [vmem:[#allocation5 + $0xb8] sm:$0xf0]  ;;  %v5184_v5 = vld [vmem:[#allocation5 + $0x38c] sm:$0xf] }
  0xcc   :  { %1923 = vmatpush.bf16.msrb.mxu0 %v3978_v26  ;;  %1936 = vmatpush.bf16.msrb.mxu1 %v4106_v28  ;;  %v1670_v0 = vpop.f32.mrf.mxu0  ;;  %v5745_v7 = vadd.f32 %v1707_v60, %v1695_v59  ;;  %v5196_v26 = vld [vmem:[#allocation5 + $0x3ec] sm:$0xf]  ;;  %v4314_v28 = vor.u32 %v5298_v13, %v4313_v12  ;;  %v1709_v39 = vpop.f32.mrf.mxu3  ;;  %v3755_v56 = vld [vmem:[#allocation5 + $0x2b8] sm:$0xf0]  ;;  %v3502_v59 = vor.u32 %v5092_v50, %v3499_v51 }
  0xcd   :  { %1949 = vmatpush.bf16.msrb.mxu2 %v4234_v29  ;;  %v3534_v29 = vor.u32 %v5100_v14, %v3531_v16  ;;  %v3918_v41 = vor.u32 %v5196_v26, %v3915_v27  ;;  %v5120_v0 = vld [vmem:[#allocation5 + $0x18c] sm:$0xf]  ;;  %v3742_v14 = vor.u32 %v5152_v3, %v3739_v4  ;;  %v3467_v17 = vld [vmem:[#allocation5 + $0x78] sm:$0xf0] }
  0xce   :  { %1962 = vmatpush.bf16.msrb.mxu3 %v4362_v35  ;;  %v3515_v35 = vld [vmem:[#allocation5 + $0xd8] sm:$0xf0]  ;;  %v5084_v16 = vld [vmem:[#allocation5 + $0x6c] sm:$0xf] }
  0xcf   :  { %v5180_v26 = vld [vmem:[#allocation5 + $0x36c] sm:$0xf]  ;;  %v3851_v27 = vld [vmem:[#allocation5 + $0x378] sm:$0xf0] }
  0xd0   :  { %1924 = vmatpush.bf16.msrb.mxu0 %v3962_v44  ;;  %1937 = vmatpush.bf16.msrb.mxu1 %v4090_v46  ;;  %v3771_v44 = vld [vmem:[#allocation5 + $0x2d8] sm:$0xf0]  ;;  %v5072_v63 = vld [vmem:[#allocation5 + $0xc] sm:$0xf] }
  0xd1   :  { %1950 = vmatpush.bf16.msrb.mxu2 %v4218_v47  ;;  %v1696_v30 = vpop.f32.mrf.mxu2  ;;  %v3899_v46 = vld [vmem:[#allocation5 + $0x3d8] sm:$0xf0]  ;;  %v3518_v47 = vor.u32 %v5096_v33, %v3515_v35  ;;  %v3774_v49 = vor.u32 %v5160_v43, %v3771_v44  ;;  %v5112_v35 = vld [vmem:[#allocation5 + $0x14c] sm:$0xf] }
  0xd2   :  { %1963 = vmatpush.bf16.msrb.mxu3 %v4346_v52  ;;  %v5124_v52 = vld [vmem:[#allocation5 + $0x1ac] sm:$0xf]  ;;  %v3902_v53 = vor.u32 %v5192_v45, %v3899_v46  ;;  %v3451_v33 = vld [vmem:[#allocation5 + $0x58] sm:$0xf0] }
  0xd3   :  { %v3630_v60 = vor.u32 %v5124_v52, %v3627_v54  ;;  %v3579_v39 = vld [vmem:[#allocation5 + $0x158] sm:$0xf0]  ;;  %v5176_v45 = vld [vmem:[#allocation5 + $0x34c] sm:$0xf] }
  0xd4   :  { %1925 = vmatpush.bf16.msrb.mxu0 %v3946_v61  ;;  %1938 = vmatpush.bf16.msrb.mxu1 %v4074_v1  ;;  %v3758_v61 = vor.u32 %v5156_v55, %v3755_v56  ;;  %v3886_v1 = vor.u32 %v5188_v57, %v3883_v58  ;;  %v3835_v46 = vld [vmem:[#allocation5 + $0x358] sm:$0xf0]  ;;  %v3582_v50 = vor.u32 %v5112_v35, %v3579_v39  ;;  %v5076_v52 = vld [vmem:[#allocation5 + $0x2c] sm:$0xf] }
  0xd5   :  { %1951 = vmatpush.bf16.msrb.mxu2 %v4202_v2  ;;  %v3611_v2 = vld [vmem:[#allocation5 + $0x198] sm:$0xf0]  ;;  %v5108_v54 = vld [vmem:[#allocation5 + $0x12c] sm:$0xf]  ;;  %v3838_v56 = vor.u32 %v5176_v45, %v3835_v46 }
  0xd6   :  { %1964 = vmatpush.bf16.msrb.mxu3 %v4330_v10  ;;  %v3867_v10 = vld [vmem:[#allocation5 + $0x398] sm:$0xf0]  ;;  %v3614_v13 = vor.u32 %v5120_v0, %v3611_v2  ;;  %v5140_v58 = vld [vmem:[#allocation5 + $0x22c] sm:$0xf] }
  0xd7   :  { %v3870_v21 = vor.u32 %v5184_v5, %v3867_v10  ;;  %v3563_v57 = vld [vmem:[#allocation5 + $0x138] sm:$0xf0]  ;;  %v5104_v3 = vld [vmem:[#allocation5 + $0x10c] sm:$0xf] }
  0xd8   :  { %1926 = vmatpush.bf16.msrb.mxu0 %v3930_v18  ;;  %1939 = vmatpush.bf16.msrb.mxu1 %v4058_v23  ;;  %v1720_v12 = vpop.f32.mrf.mxu0  ;;  %v5116_v18 = vld [vmem:[#allocation5 + $0x16c] sm:$0xf]  ;;  %v1733_v20 = vpop.f32.mrf.mxu1  ;;  %v3419_v0 = vld [vmem:[#allocation5 + $0x18] sm:$0xf0] }
  0xd9   :  { %1952 = vmatpush.bf16.msrb.mxu2 %v4186_v24  ;;  %v1721_v19 = vadd.f32 %v1720_v12, %v5745_v7  ;;  %v5148_v23 = vld [vmem:[#allocation5 + $0x26c] sm:$0xf]  ;;  %v3723_v24 = vld [vmem:[#allocation5 + $0x278] sm:$0xf0]  ;;  %v3598_v30 = vor.u32 %v5116_v18, %v3595_v22  ;;  %v3854_v7 = vor.u32 %v5180_v26, %v3851_v27 }
  0xda   :  { %1965 = vmatpush.bf16.msrb.mxu3 %v4314_v28  ;;  %v3547_v4 = vld [vmem:[#allocation5 + $0x118] sm:$0xf0]  ;;  %v5136_v5 = vld [vmem:[#allocation5 + $0x20c] sm:$0xf] }
  0xdb   :  { %1927 = vmatmul.bf16.vlgmr.msrb.gmra.mxu0 %v5720_v37  ;;  %1940 = vmatmul.bf16.vlgmr.msrb.gmra.mxu1 %v5724_v40  ;;  %v1734_v28 = vadd.f32 %v1733_v20, %v1721_v19  ;;  %v3675_v12 = vld [vmem:[#allocation5 + $0x218] sm:$0xf0]  ;;  %v5260_v19 = vld [vmem:[#allocation5 + $0x5ec] sm:$0xf]  ;;  %v3422_v20 = vor.u32 %v5072_v63, %v3419_v0 }
  0xdc   :  { %1971 = vmatpush.bf16.msra.mxu0 %v3534_v29  ;;  %1984 = vmatpush.bf16.msra.mxu1 %v3662_v31  ;;  %v3470_v29 = vor.u32 %v5084_v16, %v3467_v17  ;;  %v3726_v31 = vor.u32 %v5148_v23, %v3723_v24  ;;  %v5228_v17 = vld [vmem:[#allocation5 + $0x4ec] sm:$0xf]  ;;  %v4043_v18 = vld [vmem:[#allocation5 + $0x4f8] sm:$0xf0]  ;;  %v3550_v24 = vor.u32 %v5104_v3, %v3547_v4 }
  0xdd   :  { %1997 = vmatpush.bf16.msra.mxu2 %v3790_v32  ;;  %1966 = vmatmul.bf16.vlgmr.msrb.gmra.mxu3 %v5722_v38  ;;  %v5080_v32 = vld [vmem:[#allocation5 + $0x4c] sm:$0xf]  ;;  %v4299_v23 = vld [vmem:[#allocation5 + $0x6f8] sm:$0xf0]  ;;  %v3678_v26 = vor.u32 %v5136_v5, %v3675_v12 }
  0xde   :  { %2010 = vmatpush.bf16.msra.mxu3 %v3918_v41  ;;  %1953 = vmatmul.bf16.vlgmr.msrb.gmra.mxu2 %v5718_v34  ;;  %v5144_v41 = vld [vmem:[#allocation5 + $0x24c] sm:$0xf]  ;;  %v4027_v35 = vld [vmem:[#allocation5 + $0x4d8] sm:$0xf0] }
  0xdf   :  { %v3710_v51 = vor.u32 %v5144_v41, %v3707_v42  ;;  %v5292_v22 = vld [vmem:[#allocation5 + $0x6ec] sm:$0xf]  ;;  %v4155_v39 = vld [vmem:[#allocation5 + $0x5d8] sm:$0xf0] }
  0xe0   :  { %1972 = vmatpush.bf16.msra.mxu0 %v3518_v47  ;;  %1985 = vmatpush.bf16.msra.mxu1 %v3646_v48  ;;  %v1759_v44 = vpop.f32.mrf.mxu3  ;;  %v3454_v47 = vor.u32 %v5080_v32, %v3451_v33  ;;  %v1735_v55 = vpop.f32.mrf.mxu1  ;;  %v5324_v27 = vld [vmem:[#allocation5 + $0x7ec] sm:$0xf]  ;;  %v4302_v32 = vor.u32 %v5292_v22, %v4299_v23  ;;  %v4283_v42 = vld [vmem:[#allocation5 + $0x6d8] sm:$0xf0] }
  0xe1   :  { %1998 = vmatpush.bf16.msra.mxu2 %v3774_v49  ;;  %v1746_v36 = vpop.f32.mrf.mxu2  ;;  %v1722_v49 = vpop.f32.mrf.mxu0  ;;  %v5224_v33 = vld [vmem:[#allocation5 + $0x4cc] sm:$0xf]  ;;  %v4267_v55 = vld [vmem:[#allocation5 + $0x6b8] sm:$0xf0] }
  0xe2   :  { %2011 = vmatpush.bf16.msra.mxu3 %v3902_v53  ;;  %v1747_v43 = vadd.f32 %v1746_v36, %v1734_v28  ;;  %v3435_v53 = vld [vmem:[#allocation5 + $0x38] sm:$0xf0]  ;;  %v5256_v36 = vld [vmem:[#allocation5 + $0x5cc] sm:$0xf]  ;;  %v4030_v45 = vor.u32 %v5224_v33, %v4027_v35 }
  0xe3   :  { %v3438_v62 = vor.u32 %v5076_v52, %v3435_v53  ;;  %v4427_v28 = vld [vmem:[#allocation5 + $0x7f8] sm:$0xf0]  ;;  %v5288_v41 = vld [vmem:[#allocation5 + $0x6cc] sm:$0xf]  ;;  %v4158_v46 = vor.u32 %v5256_v36, %v4155_v39 }
  0xe4   :  { %1973 = vmatpush.bf16.msra.mxu0 %v3502_v59  ;;  %1986 = vmatpush.bf16.msra.mxu1 %v3630_v60  ;;  %v5752_v48 = vadd.f32 %v1759_v44, %v1747_v43  ;;  %v3691_v59 = vld [vmem:[#allocation5 + $0x238] sm:$0xf0]  ;;  %v5172_v60 = vld [vmem:[#allocation5 + $0x32c] sm:$0xf] }
  0xe5   :  { %1999 = vmatpush.bf16.msra.mxu2 %v3758_v61  ;;  %v3819_v61 = vld [vmem:[#allocation5 + $0x338] sm:$0xf0]  ;;  %v3694_v2 = vor.u32 %v5140_v58, %v3691_v59  ;;  %v5320_v43 = vld [vmem:[#allocation5 + $0x7cc] sm:$0xf] }
  0xe6   :  { %2012 = vmatpush.bf16.msra.mxu3 %v3886_v1  ;;  %v3566_v1 = vor.u32 %v5108_v54, %v3563_v57  ;;  %v4411_v44 = vld [vmem:[#allocation5 + $0x7d8] sm:$0xf0]  ;;  %v5220_v49 = vld [vmem:[#allocation5 + $0x4ac] sm:$0xf] }
  0xe7   :  { %v4414_v52 = vor.u32 %v5320_v43, %v4411_v44  ;;  %v4139_v53 = vld [vmem:[#allocation5 + $0x5b8] sm:$0xf0]  ;;  %v5284_v54 = vld [vmem:[#allocation5 + $0x6ac] sm:$0xf] }
  0xe8   :  { %1974 = vmatpush.bf16.msra.mxu0 %v3486_v11  ;;  %1987 = vmatpush.bf16.msra.mxu1 %v3614_v13  ;;  %v3822_v11 = vor.u32 %v5172_v60, %v3819_v61  ;;  %v5168_v13 = vld [vmem:[#allocation5 + $0x30c] sm:$0xf]  ;;  %v1761_v16 = vpop.f32.mrf.mxu3  ;;  %v4395_v57 = vld [vmem:[#allocation5 + $0x7b8] sm:$0xf0]  ;;  %v4270_v60 = vor.u32 %v5284_v54, %v4267_v55  ;;  %v372_v54 = vperm.slane %v5742_v6, 1 }
  0xe9   :  { %2000 = vmatpush.bf16.msra.mxu2 %v3742_v14  ;;  %v1748_v10 = vpop.f32.mrf.mxu2  ;;  %v3803_v14 = vld [vmem:[#allocation5 + $0x318] sm:$0xf0]  ;;  %v5216_v61 = vld [vmem:[#allocation5 + $0x48c] sm:$0xf]  ;;  %v5357_v6 = vld [vmem:[#allocation7 + $0xec] sm:$0xf0] }
  0xea   :  { %2013 = vmatpush.bf16.msra.mxu3 %v3870_v21  ;;  %v4171_v21 = vld [vmem:[#allocation5 + $0x5f8] sm:$0xf0]  ;;  %v5312_v3 = vld [vmem:[#allocation5 + $0x78c] sm:$0xf] }
  0xeb   :  { %v4123_v0 = vld [vmem:[#allocation5 + $0x598] sm:$0xf0]  ;;  %v5212_v10 = vld [vmem:[#allocation5 + $0x46c] sm:$0xf] }
  0xec   :  { %1975 = vmatpush.bf16.msra.mxu0 %v3470_v29  ;;  %1988 = vmatpush.bf16.msra.mxu1 %v3598_v30  ;;  %v3806_v29 = vor.u32 %v5168_v13, %v3803_v14  ;;  %v4046_v30 = vor.u32 %v5228_v17, %v4043_v18  ;;  %v5244_v12 = vld [vmem:[#allocation5 + $0x56c] sm:$0xf]  ;;  %v4107_v16 = vld [vmem:[#allocation5 + $0x578] sm:$0xf0] }
  0xed   :  { %2001 = vmatpush.bf16.msra.mxu2 %v3726_v31  ;;  %v4174_v31 = vor.u32 %v5260_v19, %v4171_v21  ;;  %v5276_v17 = vld [vmem:[#allocation5 + $0x66c] sm:$0xf]  ;;  %v4235_v18 = vld [vmem:[#allocation5 + $0x678] sm:$0xf0]  ;;  %v4110_v22 = vor.u32 %v5244_v12, %v4107_v16 }
  0xee   :  { %2014 = vmatpush.bf16.msra.mxu3 %v3854_v7  ;;  %v4430_v7 = vor.u32 %v5324_v27, %v4427_v28  ;;  %v5308_v19 = vld [vmem:[#allocation5 + $0x76c] sm:$0xf]  ;;  %v4238_v23 = vor.u32 %v5276_v17, %v4235_v18  ;;  %v4347_v36 = vld [vmem:[#allocation5 + $0x758] sm:$0xf0]  ;;  %v4801_v17 = vld [vmem:[#allocation7 + $0x2e0] sm:$0xf] }
  0xef   :  { %v5240_v27 = vld [vmem:[#allocation5 + $0x54c] sm:$0xf]  ;;  %v3947_v44 = vld [vmem:[#allocation5 + $0x438] sm:$0xf0]  ;;  %v5421_v18 = vld [vmem:[#allocation7 + $0x2ec] sm:$0xf0] }
  0xf0   :  { %1976 = vmatpush.bf16.msra.mxu0 %v3454_v47  ;;  %1989 = vmatpush.bf16.msra.mxu1 %v3582_v50  ;;  %v4286_v47 = vor.u32 %v5288_v41, %v4283_v42  ;;  %v4011_v50 = vld [vmem:[#allocation5 + $0x4b8] sm:$0xf0]  ;;  %v5304_v35 = vld [vmem:[#allocation5 + $0x74c] sm:$0xf] }
  0xf1   :  { %2002 = vmatpush.bf16.msra.mxu2 %v3710_v51  ;;  %v5252_v51 = vld [vmem:[#allocation5 + $0x5ac] sm:$0xf]  ;;  %v4014_v58 = vor.u32 %v5220_v49, %v4011_v50  ;;  %v4075_v49 = vld [vmem:[#allocation5 + $0x538] sm:$0xf0] }
  0xf2   :  { %2015 = vmatpush.bf16.msra.mxu3 %v3838_v56  ;;  %v5316_v56 = vld [vmem:[#allocation5 + $0x7ac] sm:$0xf]  ;;  %v4142_v59 = vor.u32 %v5252_v51, %v4139_v53  ;;  %v4203_v51 = vld [vmem:[#allocation5 + $0x638] sm:$0xf0] }
  0xf3   :  { %v4398_v63 = vor.u32 %v5316_v56, %v4395_v57  ;;  %v5204_v43 = vld [vmem:[#allocation5 + $0x42c] sm:$0xf]  ;;  %v4331_v53 = vld [vmem:[#allocation5 + $0x738] sm:$0xf0] }
  0xf4   :  { %1977 = vmatpush.bf16.msra.mxu0 %v3438_v62  ;;  %1990 = vmatpush.bf16.msra.mxu1 %v3566_v1  ;;  %v3995_v62 = vld [vmem:[#allocation5 + $0x498] sm:$0xf0]  ;;  %v5280_v1 = vld [vmem:[#allocation5 + $0x68c] sm:$0xf]  ;;  %v3950_v55 = vor.u32 %v5204_v43, %v3947_v44  ;;  %v4497_v43 = vld [vmem:[#allocation7 + $0x80] sm:$0xf] }
  0xf5   :  { %2003 = vmatpush.bf16.msra.mxu2 %v3694_v2  ;;  %v4251_v2 = vld [vmem:[#allocation5 + $0x698] sm:$0xf0]  ;;  %v5268_v50 = vld [vmem:[#allocation5 + $0x62c] sm:$0xf]  ;;  %v5345_v44 = vld [vmem:[#allocation7 + $0x8c] sm:$0xf0] }
  0xf6   :  { %2016 = vmatpush.bf16.msra.mxu3 %v3822_v11  ;;  %v4254_v5 = vor.u32 %v5280_v1, %v4251_v2  ;;  %v3979_v11 = vld [vmem:[#allocation5 + $0x478] sm:$0xf0]  ;;  %v5200_v56 = vld [vmem:[#allocation5 + $0x40c] sm:$0xf] }
  0xf7   :  { %v3982_v21 = vor.u32 %v5212_v10, %v3979_v11  ;;  %v5296_v1 = vld [vmem:[#allocation5 + $0x70c] sm:$0xf]  ;;  %v5389_v10 = vld [vmem:[#allocation7 + $0x1ec] sm:$0xf0] }
  0xf8   :  { %1978 = vmatpush.bf16.msra.mxu0 %v3422_v20  ;;  %1991 = vmatpush.bf16.msra.mxu1 %v3550_v24  ;;  %v5758_v4 = vpop.f32.mrf.mxu0  ;;  %v5760_v13 = vpop.f32.mrf.mxu1  ;;  %v4363_v20 = vld [vmem:[#allocation5 + $0x778] sm:$0xf0]  ;;  %v5208_v24 = vld [vmem:[#allocation5 + $0x44c] sm:$0xf] }
  0xf9   :  { %2004 = vmatpush.bf16.msra.mxu2 %v3678_v26  ;;  %v3963_v26 = vld [vmem:[#allocation5 + $0x458] sm:$0xf0] }
  0xfa   :  { %2017 = vmatpush.bf16.msra.mxu3 %v3806_v29  ;;  %v4366_v29 = vor.u32 %v5308_v19, %v4363_v20 }
  0xfb   :  { %1979 = vmatmul.bf16.vlgmr.msra.gmra.mxu0 %v5708_v9  ;;  %1992 = vmatmul.bf16.vlgmr.msra.gmra.mxu1 %v5715_v25  ;;  %v4379_v9 = vld [vmem:[#allocation5 + $0x798] sm:$0xf0] }
  0xfc   :  { %2023 = vmatpush.bf16.msrb.mxu0 %v4046_v30  ;;  %2036 = vmatpush.bf16.msrb.mxu1 %v4174_v31  ;;  %v4382_v14 = vor.u32 %v5312_v3, %v4379_v9  ;;  %v4091_v30 = vld [vmem:[#allocation5 + $0x558] sm:$0xf0]  ;;  %v5272_v31 = vld [vmem:[#allocation5 + $0x64c] sm:$0xf]  ;;  %v4545_v9 = vld [vmem:[#allocation7 + $0xe0] sm:$0xf] }
  0xfd   :  { %2049 = vmatpush.bf16.msrb.mxu2 %v4302_v32  ;;  %2018 = vmatmul.bf16.vlgmr.msra.gmra.mxu3 %v5710_v15  ;;  %v3998_v15 = vor.u32 %v5216_v61, %v3995_v62  ;;  %v4219_v32 = vld [vmem:[#allocation5 + $0x658] sm:$0xf0]  ;;  %v4094_v41 = vor.u32 %v5240_v27, %v4091_v30  ;;  %v4546_v16 = vor.u32 %v5357_v6, %v4545_v9  ;;  %v4785_v27 = vld [vmem:[#allocation7 + $0x2c0] sm:$0xf] }
  0xfe   :  { %2062 = vmatpush.bf16.msrb.mxu3 %v4430_v7  ;;  %2005 = vmatmul.bf16.vlgmr.msra.gmra.mxu2 %v5706_v8  ;;  %v5248_v8 = vld [vmem:[#allocation5 + $0x58c] sm:$0xf]  ;;  %v3966_v7 = vor.u32 %v5208_v24, %v3963_v26  ;;  %v4222_v42 = vor.u32 %v5272_v31, %v4219_v32  ;;  %v4059_v61 = vld [vmem:[#allocation5 + $0x518] sm:$0xf0]  ;;  %v4802_v24 = vor.u32 %v5421_v18, %v4801_v17  ;;  %v5349_v32 = vld [vmem:[#allocation7 + $0xac] sm:$0xf0] }
  0xff   :  { %v4126_v25 = vor.u32 %v5248_v8, %v4123_v0  ;;  %v4187_v0 = vld [vmem:[#allocation5 + $0x618] sm:$0xf0]  ;;  %v5365_v17 = vld [vmem:[#allocation7 + $0x12c] sm:$0xf0] }
 0x100   :  { %2024 = vmatpush.bf16.msrb.mxu0 %v4030_v45  ;;  %2037 = vmatpush.bf16.msrb.mxu1 %v4158_v46  ;;  %v5764_v33 = vpop.f32.mrf.mxu3  ;;  %v1774_v39 = vpop.f32.mrf.mxu0  ;;  %v5236_v45 = vld [vmem:[#allocation5 + $0x52c] sm:$0xf]  ;;  %v4315_v3 = vld [vmem:[#allocation5 + $0x718] sm:$0xf0] }
 0x101   :  { %2050 = vmatpush.bf16.msrb.mxu2 %v4286_v47  ;;  %v5762_v28 = vpop.f32.mrf.mxu2  ;;  %v1787_v46 = vpop.f32.mrf.mxu1  ;;  %v4350_v47 = vor.u32 %v5304_v35, %v4347_v36  ;;  %v4078_v57 = vor.u32 %v5236_v45, %v4075_v49  ;;  %v4641_v35 = vld [vmem:[#allocation7 + $0x1a0] sm:$0xf]  ;;  %v5381_v36 = vld [vmem:[#allocation7 + $0x1ac] sm:$0xf0] }
 0x102   :  { %2063 = vmatpush.bf16.msrb.mxu3 %v4414_v52  ;;  %v5300_v52 = vld [vmem:[#allocation5 + $0x72c] sm:$0xf]  ;;  %v4625_v45 = vld [vmem:[#allocation7 + $0x180] sm:$0xf]  ;;  %v4498_v46 = vor.u32 %v5345_v44, %v4497_v43  ;;  %v5409_v49 = vld [vmem:[#allocation7 + $0x28c] sm:$0xf0] }
 0x103   :  { %v4334_v8 = vor.u32 %v5300_v52, %v4331_v53  ;;  %v5341_v52 = vld [vmem:[#allocation7 + $0x6c] sm:$0xf0]  ;;  %v5419_v44 = vld [vmem:[#allocation7 + $0x2e4] sm:$0xf] }
 0x104   :  { %2025 = vmatpush.bf16.msrb.mxu0 %v4014_v58  ;;  %2038 = vmatpush.bf16.msrb.mxu1 %v4142_v59  ;;  %v4206_v58 = vor.u32 %v5268_v50, %v4203_v51  ;;  %v3931_v59 = vld [vmem:[#allocation5 + $0x418] sm:$0xf0]  ;;  %v4481_v51 = vld [vmem:[#allocation7 + $0x60] sm:$0xf] }
 0x105   :  { %2051 = vmatpush.bf16.msrb.mxu2 %v4270_v60  ;;  %v5232_v60 = vld [vmem:[#allocation5 + $0x50c] sm:$0xf] }
 0x106   :  { %2064 = vmatpush.bf16.msrb.mxu3 %v4398_v63  ;;  %v5264_v63 = vld [vmem:[#allocation5 + $0x60c] sm:$0xf]  ;;  %v4062_v11 = vor.u32 %v5232_v60, %v4059_v61  ;;  %v5405_v60 = vld [vmem:[#allocation7 + $0x26c] sm:$0xf0] }
 0x107   :  { %v4190_v12 = vor.u32 %v5264_v63, %v4187_v0  ;;  %v4593_v0 = vld [vmem:[#allocation7 + $0x140] sm:$0xf] }
 0x108   :  { %2026 = vmatpush.bf16.msrb.mxu0 %v3998_v15  ;;  %2039 = vmatpush.bf16.msrb.mxu1 %v4126_v25  ;;  %v1813_v2 = vpop.f32.mrf.mxu3  ;;  %v1773_v15 = vadd.f32 %v5758_v4, %v372_v54  ;;  %v3934_v25 = vor.u32 %v5200_v56, %v3931_v59  ;;  %v4657_v4 = vld [vmem:[#allocation7 + $0x1c0] sm:$0xf] }
 0x109   :  { %2052 = vmatpush.bf16.msrb.mxu2 %v4254_v5  ;;  %v1800_v62 = vpop.f32.mrf.mxu2  ;;  %v4673_v5 = vld [vmem:[#allocation7 + $0x1e0] sm:$0xf] }
 0x10a   :  { %2065 = vmatpush.bf16.msrb.mxu3 %v4382_v14  ;;  %v4318_v14 = vor.u32 %v5296_v1, %v4315_v3  ;;  %v4674_v19 = vor.u32 %v5389_v10, %v4673_v5  ;;  %v1786_v20 = vadd.f32 %v5760_v13, %v1773_v15  ;;  %v4513_v13 = vld [vmem:[#allocation7 + $0xa0] sm:$0xf]  ;;  %v5369_v1 = vld [vmem:[#allocation7 + $0x14c] sm:$0xf0] }
 0x10b   :  { %v4514_v39 = vor.u32 %v5349_v32, %v4513_v13  ;;  %v4737_v59 = vld [vmem:[#allocation7 + $0x260] sm:$0xf]  ;;  %v5401_v5 = vld [vmem:[#allocation7 + $0x24c] sm:$0xf0]  ;;  %v4594_v10 = vor.u32 %v5369_v1, %v4593_v0  ;;  %v5387_v32 = vld [vmem:[#allocation7 + $0x1e4] sm:$0xf] }
 0x10c   :  { %2027 = vmatpush.bf16.msrb.mxu0 %v3982_v21  ;;  %2040 = vmatpush.bf16.msrb.mxu1 %v4110_v22  ;;  %v4529_v21 = vld [vmem:[#allocation7 + $0xc0] sm:$0xf]  ;;  %v5353_v22 = vld [vmem:[#allocation7 + $0xcc] sm:$0xf0]  ;;  %v1799_v31 = vadd.f32 %v5762_v28, %v1786_v20  ;;  %v4642_v28 = vor.u32 %v5381_v36, %v4641_v35  ;;  %v4738_v3 = vor.u32 %v5405_v60, %v4737_v59  ;;  %v4675_v35 = vld [vmem:[#allocation7 + $0x1f0] sm:$0xf0] }
 0x10d   :  { %2053 = vmatpush.bf16.msrb.mxu2 %v4238_v23  ;;  %v5385_v23 = vld [vmem:[#allocation7 + $0x1cc] sm:$0xf0]  ;;  %v4530_v26 = vor.u32 %v5353_v22, %v4529_v21  ;;  %v4465_v62 = vld [vmem:[#allocation7 + $0x40] sm:$0xf]  ;;  %v4499_v0 = vld [vmem:[#allocation7 + $0x90] sm:$0xf0] }
 0x10e   :  { %2066 = vmatpush.bf16.msrb.mxu3 %v4366_v29  ;;  %v5417_v29 = vld [vmem:[#allocation7 + $0x2cc] sm:$0xf0]  ;;  %v4658_v30 = vor.u32 %v5385_v23, %v4657_v4  ;;  %v4705_v21 = vld [vmem:[#allocation7 + $0x220] sm:$0xf]  ;;  %v5375_v1 = vld [vmem:[#allocation7 + $0x184] sm:$0xf] }
 0x10f   :  { %v5397_v22 = vld [vmem:[#allocation7 + $0x22c] sm:$0xf0]  ;;  %v4433_v23 = vld [vmem:[#allocation7] sm:$0xf] }
 0x110   :  { %2028 = vmatpush.bf16.msrb.mxu0 %v3966_v7  ;;  %2041 = vmatpush.bf16.msrb.mxu1 %v4094_v41  ;;  %v4786_v7 = vor.u32 %v5417_v29, %v4785_v27  ;;  %v4769_v41 = vld [vmem:[#allocation7 + $0x2a0] sm:$0xf]  ;;  %v5361_v29 = vld [vmem:[#allocation7 + $0x10c] sm:$0xf0]  ;;  %v4706_v36 = vor.u32 %v5397_v22, %v4705_v21  ;;  %v5335_v22 = vld [vmem:[#allocation7 + $0x44] sm:$0xf] }
 0x111   :  { %2054 = vmatpush.bf16.msrb.mxu2 %v4222_v42  ;;  %v5413_v42 = vld [vmem:[#allocation7 + $0x2ac] sm:$0xf0] }
 0x112   :  { %2067 = vmatpush.bf16.msrb.mxu3 %v4350_v47 }
 0x114   :  { %2029 = vmatpush.bf16.msrb.mxu0 %v3950_v55  ;;  %2042 = vmatpush.bf16.msrb.mxu1 %v4078_v57  ;;  %v4609_v55 = vld [vmem:[#allocation7 + $0x160] sm:$0xf]  ;;  %v4482_v57 = vor.u32 %v5341_v52, %v4481_v51 }
 0x115   :  { %2055 = vmatpush.bf16.msrb.mxu2 %v4206_v58 }
 0x116   :  { %2068 = vmatpush.bf16.msrb.mxu3 %v4334_v8  ;;  %v5337_v8 = vld [vmem:[#allocation7 + $0x4c] sm:$0xf0] }
 0x117   :  { %v4466_v9 = vor.u32 %v5337_v8, %v4465_v62  ;;  %v4771_v62 = vld [vmem:[#allocation7 + $0x2b0] sm:$0xf0] }
 0x118   :  { %2030 = vmatpush.bf16.msrb.mxu0 %v3934_v25  ;;  %2043 = vmatpush.bf16.msrb.mxu1 %v4062_v11  ;;  %v1824_v47 = vpop.f32.mrf.mxu0  ;;  %v1837_v54 = vpop.f32.mrf.mxu1  ;;  %v4721_v25 = vld [vmem:[#allocation7 + $0x240] sm:$0xf] }
 0x119   :  { %2056 = vmatpush.bf16.msrb.mxu2 %v4190_v12  ;;  %v4449_v11 = vld [vmem:[#allocation7 + $0x20] sm:$0xf]  ;;  %v5333_v12 = vld [vmem:[#allocation7 + $0x2c] sm:$0xf0]  ;;  %v4722_v18 = vor.u32 %v5401_v5, %v4721_v25  ;;  %v5339_v5 = vld [vmem:[#allocation7 + $0x64] sm:$0xf] }
 0x11a   :  { %2069 = vmatpush.bf16.msrb.mxu3 %v4318_v14  ;;  %v4450_v20 = vor.u32 %v5333_v12, %v4449_v11  ;;  %v5371_v12 = vld [vmem:[#allocation7 + $0x164] sm:$0xf] }
 0x11b   :  { %2031 = vmatmul.bf16.vlgmr.msrb.gmra.mxu0 %v5720_v37  ;;  %2044 = vmatmul.bf16.vlgmr.msrb.gmra.mxu1 %v5724_v40  ;;  %v1812_v37 = vadd.f32 %v5764_v33, %v1799_v31  ;;  %v5377_v40 = vld [vmem:[#allocation7 + $0x18c] sm:$0xf0]  ;;  %v4547_v31 = vld [vmem:[#allocation7 + $0xf0] sm:$0xf0] }
 0x11c   :  { %2860 = vmatpush.bf16.msra.mxu0 %v4546_v16  ;;  %2873 = vmatpush.bf16.msra.mxu1 %v4674_v19  ;;  %v4626_v50 = vor.u32 %v5377_v40, %v4625_v45  ;;  %v5373_v33 = vld [vmem:[#allocation7 + $0x16c] sm:$0xf0]  ;;  %v4577_v16 = vld [vmem:[#allocation7 + $0x120] sm:$0xf]  ;;  %v4803_v45 = vld [vmem:[#allocation7 + $0x2f0] sm:$0xf0]  ;;  %v4678_v40 = vor.u32 %v5387_v32, %v4675_v35 }
 0x11d   :  { %2057 = vmatmul.bf16.vlgmr.msrb.gmra.mxu2 %v5718_v34  ;;  %2070 = vmatmul.bf16.vlgmr.msrb.gmra.mxu3 %v5722_v38  ;;  %v4770_v34 = vor.u32 %v5413_v42, %v4769_v41  ;;  %v4753_v38 = vld [vmem:[#allocation7 + $0x280] sm:$0xf]  ;;  %v1825_v53 = vadd.f32 %v1824_v47, %v1812_v37  ;;  %v4610_v61 = vor.u32 %v5373_v33, %v4609_v55  ;;  %v5393_v42 = vld [vmem:[#allocation7 + $0x20c] sm:$0xf0]  ;;  %v2075_v37 = vmax.f32 %v5752_v48, 0.0 }
 0x11e   :  { %2886 = vmatpush.bf16.msra.mxu2 %v4802_v24  ;;  %v4754_v56 = vor.u32 %v5409_v49, %v4753_v38  ;;  %v4578_v4 = vor.u32 %v5365_v17, %v4577_v16  ;;  %v5329_v24 = vld [vmem:[#allocation7 + $0xc] sm:$0xf0]  ;;  %v4689_v41 = vld [vmem:[#allocation7 + $0x200] sm:$0xf]  ;;  %v5383_v47 = vld [vmem:[#allocation7 + $0x1c4] sm:$0xf]  ;;  %v4806_v51 = vor.u32 %v5419_v44, %v4803_v45 }
 0x11f   :  { %v1838_v58 = vadd.f32 %v1837_v54, %v1825_v53  ;;  %v4659_v38 = vld [vmem:[#allocation7 + $0x1d0] sm:$0xf0]  ;;  %v4690_v49 = vor.u32 %v5393_v42, %v4689_v41  ;;  %v5778_v52 = vpack.c.bf16 %v2075_v37, %v2075_v37  ;;  %v5415_v53 = vld [vmem:[#allocation7 + $0x2c4] sm:$0xf]  ;;  %v5788_v37 = vld [vmem:[#allocation10] sm:$0xf] }
 0x120   :  { %2861 = vmatpush.bf16.msra.mxu0 %v4530_v26  ;;  %2874 = vmatpush.bf16.msra.mxu1 %v4658_v30  ;;  %v1863_v2 = vpop.f32.mrf.mxu3  ;;  %v1826_v15 = vpop.f32.mrf.mxu0  ;;  %v4561_v26 = vld [vmem:[#allocation7 + $0x100] sm:$0xf]  ;;  %v5355_v30 = vld [vmem:[#allocation7 + $0xe4] sm:$0xf]  ;;  %v4787_v54 = vld [vmem:[#allocation7 + $0x2d0] sm:$0xf0]  ;;  %v4662_v55 = vor.u32 %v5383_v47, %v4659_v38 }
 0x121   :  { %v1850_v63 = vpop.f32.mrf.mxu2  ;;  %v1839_v14 = vpop.f32.mrf.mxu1  ;;  %v4550_v43 = vor.u32 %v5355_v30, %v4547_v31  ;;  %v5347_v33 = vld [vmem:[#allocation7 + $0xa4] sm:$0xf]  ;;  %v4790_v59 = vor.u32 %v5415_v53, %v4787_v54  ;;  %v4755_v15 = vld [vmem:[#allocation7 + $0x290] sm:$0xf0]  ;;  %v4553_v53 = vld [vmem:[#allocation7 + $0xe8] sm:$0xf] }
 0x122   :  { %2887 = vmatpush.bf16.msra.mxu2 %v4786_v7  ;;  %v1851_v6 = vadd.f32 %v1850_v63, %v1838_v58  ;;  %v4643_v58 = vld [vmem:[#allocation7 + $0x1b0] sm:$0xf0]  ;;  %v5343_v63 = vld [vmem:[#allocation7 + $0x84] sm:$0xf]  ;;  %v5358_v54 = vld [vmem:[#allocation7 + $0xf4] sm:$0xf0] }
 0x123   :  { %v4611_v14 = vld [vmem:[#allocation7 + $0x170] sm:$0xf0]  ;;  %v5399_v31 = vld [vmem:[#allocation7 + $0x244] sm:$0xf] }
 0x124   :  { %2862 = vmatpush.bf16.msra.mxu0 %v4514_v39  ;;  %2875 = vmatpush.bf16.msra.mxu1 %v4642_v28  ;;  %v1864_v19 = vadd.f32 %v1863_v2, %v1851_v6  ;;  %v4434_v39 = vor.u32 %v5329_v24, %v4433_v23  ;;  %v4562_v28 = vor.u32 %v5361_v29, %v4561_v26  ;;  %v4627_v2 = vld [vmem:[#allocation7 + $0x190] sm:$0xf0]  ;;  %v5407_v6 = vld [vmem:[#allocation7 + $0x284] sm:$0xf] }
 0x125   :  { %v4630_v25 = vor.u32 %v5375_v1, %v4627_v2  ;;  %v4758_v17 = vor.u32 %v5407_v6, %v4755_v15  ;;  %v4614_v21 = vor.u32 %v5371_v12, %v4611_v14  ;;  %v5367_v23 = vld [vmem:[#allocation7 + $0x144] sm:$0xf]  ;;  %v4595_v24 = vld [vmem:[#allocation7 + $0x150] sm:$0xf0]  ;;  %v4913_v1 = vld [vmem:[#allocation7 + $0x3c0] sm:$0xf] }
 0x126   :  { %2888 = vmatpush.bf16.msra.mxu2 %v4770_v34  ;;  %v2076_v7 = vmax.f32 %v1864_v19, 0.0  ;;  %v5351_v34 = vld [vmem:[#allocation7 + $0xc4] sm:$0xf]  ;;  %v4598_v32 = vor.u32 %v5367_v23, %v4595_v24  ;;  %v4579_v41 = vld [vmem:[#allocation7 + $0x130] sm:$0xf0] }
 0x127   :  { %v5403_v19 = vld [vmem:[#allocation7 + $0x264] sm:$0xf]  ;;  %v5449_v2 = vld [vmem:[#allocation7 + $0x3cc] sm:$0xf0]  ;;  %v5354_v6 = vld [vmem:[#allocation7 + $0xd4] sm:$0xf0] }
 0x128   :  { %2863 = vmatpush.bf16.msra.mxu0 %v4498_v46  ;;  %2876 = vmatpush.bf16.msra.mxu1 %v4626_v50  ;;  %v1865_v13 = vpop.f32.mrf.mxu3  ;;  %v4531_v46 = vld [vmem:[#allocation7 + $0xd0] sm:$0xf0]  ;;  %v5776_v50 = vpack.c.bf16 %v2076_v7, %v2076_v7  ;;  %v5331_v35 = vld [vmem:[#allocation7 + $0x24] sm:$0xf]  ;;  %v4914_v15 = vor.u32 %v5449_v2, %v4913_v1  ;;  %v4897_v14 = vld [vmem:[#allocation7 + $0x3a0] sm:$0xf] }
 0x129   :  { %v1852_v27 = vpop.f32.mrf.mxu2  ;;  %v4534_v48 = vor.u32 %v5351_v34, %v4531_v46  ;;  %v4723_v13 = vld [vmem:[#allocation7 + $0x250] sm:$0xf0]  ;;  %v5395_v34 = vld [vmem:[#allocation7 + $0x224] sm:$0xf]  ;;  %v4881_v24 = vld [vmem:[#allocation7 + $0x380] sm:$0xf] }
 0x12a   :  { %2889 = vmatpush.bf16.msra.mxu2 %v4754_v56  ;;  %v4515_v56 = vld [vmem:[#allocation7 + $0xb0] sm:$0xf0]  ;;  %v4726_v44 = vor.u32 %v5399_v31, %v4723_v13  ;;  %v5359_v38 = vld [vmem:[#allocation7 + $0x104] sm:$0xf]  ;;  %v4505_v31 = vld [vmem:[#allocation7 + $0x88] sm:$0xf] }
 0x12b   :  { %v4518_v60 = vor.u32 %v5347_v33, %v4515_v56  ;;  %v4707_v46 = vld [vmem:[#allocation7 + $0x230] sm:$0xf0]  ;;  %v4681_v56 = vld [vmem:[#allocation7 + $0x1e8] sm:$0xf]  ;;  %v5346_v13 = vld [vmem:[#allocation7 + $0x94] sm:$0xf0] }
 0x12c   :  { %2864 = vmatpush.bf16.msra.mxu0 %v4482_v57  ;;  %2877 = vmatpush.bf16.msra.mxu1 %v4610_v61  ;;  %v5379_v57 = vld [vmem:[#allocation7 + $0x1a4] sm:$0xf]  ;;  %v4585_v1 = vld [vmem:[#allocation7 + $0x128] sm:$0xf] }
 0x12d   :  { %v5411_v61 = vld [vmem:[#allocation7 + $0x2a4] sm:$0xf]  ;;  %v4646_v8 = vor.u32 %v5379_v57, %v4643_v58  ;;  %v5390_v57 = vld [vmem:[#allocation7 + $0x1f4] sm:$0xf0] }
 0x12e   :  { %2890 = vmatpush.bf16.msra.mxu2 %v4738_v3  ;;  %v4774_v3 = vor.u32 %v5411_v61, %v4771_v62  ;;  %v5391_v62 = vld [vmem:[#allocation7 + $0x204] sm:$0xf] }
 0x130   :  { %2865 = vmatpush.bf16.msra.mxu0 %v4466_v9  ;;  %2878 = vmatpush.bf16.msra.mxu1 %v4594_v10  ;;  %v4502_v9 = vor.u32 %v5343_v63, %v4499_v0  ;;  %v4483_v10 = vld [vmem:[#allocation7 + $0x70] sm:$0xf0]  ;;  %v4554_v0 = vor.u32 %v5358_v54, %v4553_v53  ;;  %v4473_v53 = vld [vmem:[#allocation7 + $0x48] sm:$0xf]  ;;  %v5338_v54 = vld [vmem:[#allocation7 + $0x54] sm:$0xf0] }
 0x132   :  { %2891 = vmatpush.bf16.msra.mxu2 %v4722_v18  ;;  %v4486_v18 = vor.u32 %v5339_v5, %v4483_v10  ;;  %v5386_v5 = vld [vmem:[#allocation7 + $0x1d4] sm:$0xf0] }
 0x134   :  { %2866 = vmatpush.bf16.msra.mxu0 %v4450_v20  ;;  %2879 = vmatpush.bf16.msra.mxu1 %v4578_v4  ;;  %v4739_v20 = vld [vmem:[#allocation7 + $0x270] sm:$0xf0] }
 0x135   :  { %v4467_v4 = vld [vmem:[#allocation7 + $0x50] sm:$0xf0]  ;;  %v4742_v29 = vor.u32 %v5403_v19, %v4739_v20  ;;  %v4521_v19 = vld [vmem:[#allocation7 + $0xa8] sm:$0xf]  ;;  %v5350_v20 = vld [vmem:[#allocation7 + $0xb4] sm:$0xf0] }
 0x136   :  { %2892 = vmatpush.bf16.msra.mxu2 %v4706_v36  ;;  %v4470_v30 = vor.u32 %v5335_v22, %v4467_v4  ;;  %v4451_v36 = vld [vmem:[#allocation7 + $0x30] sm:$0xf0]  ;;  %v4649_v22 = vld [vmem:[#allocation7 + $0x1a8] sm:$0xf]  ;;  %v5382_v4 = vld [vmem:[#allocation7 + $0x1b4] sm:$0xf0] }
 0x137   :  { %v4454_v45 = vor.u32 %v5331_v35, %v4451_v36  ;;  %v4633_v35 = vld [vmem:[#allocation7 + $0x188] sm:$0xf]  ;;  %v5378_v36 = vld [vmem:[#allocation7 + $0x194] sm:$0xf0] }
 0x138   :  { %2867 = vmatpush.bf16.msra.mxu0 %v4434_v39  ;;  %2880 = vmatpush.bf16.msra.mxu1 %v4562_v28  ;;  %v1876_v11 = vpop.f32.mrf.mxu0  ;;  %v5782_v16 = vpop.f32.mrf.mxu1  ;;  %v5363_v39 = vld [vmem:[#allocation7 + $0x124] sm:$0xf]  ;;  %v373_v28 = vperm.slane %v5788_v37, 2 }
 0x139   :  { %v4582_v47 = vor.u32 %v5363_v39, %v4579_v41  ;;  %v4506_v39 = vor.u32 %v5346_v13, %v4505_v31  ;;  %v5437_v41 = vld [vmem:[#allocation7 + $0x36c] sm:$0xf0]  ;;  %v4931_v31 = vld [vmem:[#allocation7 + $0x3f0] sm:$0xf0]  ;;  %v4683_v13 = vld [vmem:[#allocation7 + $0x1f8] sm:$0xf0] }
 0x13a   :  { %2893 = vmatpush.bf16.msra.mxu2 %v4690_v49  ;;  %v4929_v49 = vld [vmem:[#allocation7 + $0x3e0] sm:$0xf] }
 0x13b   :  { %2868 = vmatmul.bf16.vlgmr.msra.gmra.mxu0 %v5778_v52  ;;  %2881 = vmatmul.bf16.vlgmr.msra.gmra.mxu1 %v5776_v50 }
 0x13c   :  { %2912 = vmatpush.bf16.msrb.mxu0 %v4550_v43  ;;  %2925 = vmatpush.bf16.msrb.mxu1 %v4678_v40  ;;  %v5327_v43 = vld [vmem:[#allocation7 + $0x4] sm:$0xf]  ;;  %v4435_v40 = vld [vmem:[#allocation7 + $0x10] sm:$0xf0] }
 0x13d   :  { %v4438_v61 = vor.u32 %v5327_v43, %v4435_v40  ;;  %v5342_v43 = vld [vmem:[#allocation7 + $0x74] sm:$0xf0]  ;;  %v4617_v40 = vld [vmem:[#allocation7 + $0x168] sm:$0xf] }
 0x13e   :  { %2938 = vmatpush.bf16.msrb.mxu2 %v4806_v51  ;;  %v5453_v51 = vld [vmem:[#allocation7 + $0x3ec] sm:$0xf0] }
 0x13f   :  { %v4930_v33 = vor.u32 %v5453_v51, %v4929_v49  ;;  %v4849_v49 = vld [vmem:[#allocation7 + $0x340] sm:$0xf] }
 0x140   :  { %2913 = vmatpush.bf16.msrb.mxu0 %v4534_v48  ;;  %2926 = vmatpush.bf16.msrb.mxu1 %v4662_v55  ;;  %v5786_v27 = vpop.f32.mrf.mxu3  ;;  %v1878_v7 = vpop.f32.mrf.mxu0  ;;  %v4563_v48 = vld [vmem:[#allocation7 + $0x110] sm:$0xf0] }
 0x141   :  { %v5784_v26 = vpop.f32.mrf.mxu2  ;;  %v1891_v42 = vpop.f32.mrf.mxu1  ;;  %2899 = vmatpush.bf16.msra.mxu3 %v4930_v33  ;;  %v4566_v63 = vor.u32 %v5359_v38, %v4563_v48  ;;  %v4601_v33 = vld [vmem:[#allocation7 + $0x148] sm:$0xf] }
 0x142   :  { %2939 = vmatpush.bf16.msrb.mxu2 %v4790_v59  ;;  %v4710_v59 = vor.u32 %v5395_v34, %v4707_v46  ;;  %v4634_v42 = vor.u32 %v5378_v36, %v4633_v35  ;;  %v5374_v34 = vld [vmem:[#allocation7 + $0x174] sm:$0xf0] }
 0x143   :  { %v4618_v48 = vor.u32 %v5374_v34, %v4617_v40  ;;  %v5418_v35 = vld [vmem:[#allocation7 + $0x2d4] sm:$0xf0]  ;;  %v5352_v40 = vld [vmem:[#allocation7 + $0xcc] sm:$0xf]  ;;  %v4539_v34 = vld [vmem:[#allocation7 + $0xd8] sm:$0xf0] }
 0x144   :  { %2914 = vmatpush.bf16.msrb.mxu0 %v4518_v60  ;;  %2927 = vmatpush.bf16.msrb.mxu1 %v4646_v8  ;;  %v1877_v60 = vadd.f32 %v1876_v11, %v373_v28  ;;  %v4691_v8 = vld [vmem:[#allocation7 + $0x210] sm:$0xf0]  ;;  %v4489_v28 = vld [vmem:[#allocation7 + $0x68] sm:$0xf] }
 0x145   :  { %v4694_v10 = vor.u32 %v5391_v62, %v4691_v8  ;;  %2900 = vmatpush.bf16.msra.mxu3 %v4914_v15  ;;  %v4490_v38 = vor.u32 %v5342_v43, %v4489_v28  ;;  %v5429_v62 = vld [vmem:[#allocation7 + $0x32c] sm:$0xf0]  ;;  %v5422_v15 = vld [vmem:[#allocation7 + $0x2f4] sm:$0xf0]  ;;  %v5447_v28 = vld [vmem:[#allocation7 + $0x3c4] sm:$0xf] }
 0x146   :  { %2940 = vmatpush.bf16.msrb.mxu2 %v4774_v3  ;;  %v4682_v3 = vor.u32 %v5390_v57, %v4681_v56  ;;  %v1890_v12 = vadd.f32 %v5782_v16, %v1877_v60  ;;  %v4522_v16 = vor.u32 %v5350_v20, %v4521_v19  ;;  %v5370_v56 = vld [vmem:[#allocation7 + $0x154] sm:$0xf0]  ;;  %v4474_v60 = vor.u32 %v5338_v54, %v4473_v53  ;;  %v5425_v19 = vld [vmem:[#allocation7 + $0x30c] sm:$0xf0]  ;;  %v4915_v43 = vld [vmem:[#allocation7 + $0x3d0] sm:$0xf0] }
 0x147   :  { %v4602_v8 = vor.u32 %v5370_v56, %v4601_v33  ;;  %v4899_v53 = vld [vmem:[#allocation7 + $0x3b0] sm:$0xf0]  ;;  %v5348_v33 = vld [vmem:[#allocation7 + $0xac] sm:$0xf]  ;;  %v4523_v56 = vld [vmem:[#allocation7 + $0xb8] sm:$0xf0] }
 0x148   :  { %2915 = vmatpush.bf16.msrb.mxu0 %v4502_v9  ;;  %2928 = vmatpush.bf16.msrb.mxu1 %v4630_v25  ;;  %v1917_v58 = vpop.f32.mrf.mxu3  ;;  %v4537_v9 = vld [vmem:[#allocation7 + $0xc8] sm:$0xf]  ;;  %v1903_v23 = vadd.f32 %v5784_v26, %v1890_v12  ;;  %v4865_v26 = vld [vmem:[#allocation7 + $0x360] sm:$0xf] }
 0x149   :  { %v1904_v55 = vpop.f32.mrf.mxu2  ;;  %v4665_v25 = vld [vmem:[#allocation7 + $0x1c8] sm:$0xf]  ;;  %v4538_v11 = vor.u32 %v5354_v6, %v4537_v9  ;;  %v5366_v9 = vld [vmem:[#allocation7 + $0x134] sm:$0xf0] }
 0x14a   :  { %2941 = vmatpush.bf16.msrb.mxu2 %v4758_v17  ;;  %v5445_v17 = vld [vmem:[#allocation7 + $0x3ac] sm:$0xf0]  ;;  %v1916_v7 = vadd.f32 %v5786_v27, %v1903_v23  ;;  %v4809_v6 = vld [vmem:[#allocation7 + $0x2e8] sm:$0xf]  ;;  %v4586_v20 = vor.u32 %v5366_v9, %v4585_v1  ;;  %v5376_v9 = vld [vmem:[#allocation7 + $0x18c] sm:$0xf] }
 0x14b   :  { %v5433_v27 = vld [vmem:[#allocation7 + $0x34c] sm:$0xf0] }
 0x14c   :  { %2916 = vmatpush.bf16.msrb.mxu0 %v4486_v18  ;;  %2929 = vmatpush.bf16.msrb.mxu1 %v4614_v21  ;;  %v4666_v18 = vor.u32 %v5386_v5, %v4665_v25  ;;  %v4898_v21 = vor.u32 %v5445_v17, %v4897_v14  ;;  %v4850_v55 = vor.u32 %v5433_v27, %v4849_v49  ;;  %v4441_v5 = vld [vmem:[#allocation7 + $0x8] sm:$0xf]  ;;  %v5414_v49 = vld [vmem:[#allocation7 + $0x2b4] sm:$0xf0] }
 0x14d   :  { %v4569_v17 = vld [vmem:[#allocation7 + $0x108] sm:$0xf]  ;;  %v4918_v27 = vor.u32 %v5447_v28, %v4915_v43 }
 0x14e   :  { %2942 = vmatpush.bf16.msrb.mxu2 %v4742_v29  ;;  %2901 = vmatpush.bf16.msra.mxu3 %v4898_v21  ;;  %v5441_v29 = vld [vmem:[#allocation7 + $0x38c] sm:$0xf0]  ;;  %v4810_v21 = vor.u32 %v5422_v15, %v4809_v6  ;;  %v4635_v6 = vld [vmem:[#allocation7 + $0x198] sm:$0xf0]  ;;  %v4745_v15 = vld [vmem:[#allocation7 + $0x268] sm:$0xf] }
 0x150   :  { %2917 = vmatpush.bf16.msrb.mxu0 %v4470_v30  ;;  %2930 = vmatpush.bf16.msrb.mxu1 %v4598_v32  ;;  %v4650_v30 = vor.u32 %v5382_v4, %v4649_v22  ;;  %v4882_v32 = vor.u32 %v5441_v29, %v4881_v24  ;;  %v5362_v22 = vld [vmem:[#allocation7 + $0x114] sm:$0xf0]  ;;  %v5356_v4 = vld [vmem:[#allocation7 + $0xec] sm:$0xf]  ;;  %v4555_v29 = vld [vmem:[#allocation7 + $0xf8] sm:$0xf0] }
 0x152   :  { %2943 = vmatpush.bf16.msrb.mxu2 %v4726_v44  ;;  %2902 = vmatpush.bf16.msra.mxu3 %v4882_v32  ;;  %v4866_v44 = vor.u32 %v5437_v41, %v4865_v26  ;;  %v4793_v32 = vld [vmem:[#allocation7 + $0x2c8] sm:$0xf]  ;;  %v4570_v41 = vor.u32 %v5362_v22, %v4569_v17 }
 0x153   :  { %v4729_v22 = vld [vmem:[#allocation7 + $0x248] sm:$0xf] }
 0x154   :  { %2918 = vmatpush.bf16.msrb.mxu0 %v4454_v45  ;;  %2931 = vmatpush.bf16.msrb.mxu1 %v4582_v47 }
 0x156   :  { %2944 = vmatpush.bf16.msrb.mxu2 %v4710_v59  ;;  %2903 = vmatpush.bf16.msra.mxu3 %v4866_v44 }
 0x158   :  { %2919 = vmatpush.bf16.msrb.mxu0 %v4438_v61  ;;  %2932 = vmatpush.bf16.msrb.mxu1 %v4566_v63  ;;  %v1928_v45 = vpop.f32.mrf.mxu0  ;;  %v1941_v47 = vpop.f32.mrf.mxu1  ;;  %v4833_v61 = vld [vmem:[#allocation7 + $0x320] sm:$0xf]  ;;  %v4457_v63 = vld [vmem:[#allocation7 + $0x28] sm:$0xf] }
 0x159   :  { %v1929_v46 = vadd.f32 %v1928_v45, %v1916_v7  ;;  %v4834_v2 = vor.u32 %v5429_v62, %v4833_v61  ;;  %v4794_v45 = vor.u32 %v5418_v35, %v4793_v32  ;;  %v5439_v62 = vld [vmem:[#allocation7 + $0x384] sm:$0xf] }
 0x15a   :  { %2945 = vmatpush.bf16.msrb.mxu2 %v4694_v10  ;;  %2904 = vmatpush.bf16.msra.mxu3 %v4850_v55  ;;  %v5330_v10 = vld [vmem:[#allocation7 + $0x14] sm:$0xf0] }
 0x15b   :  { %2920 = vmatmul.bf16.vlgmr.msrb.gmra.mxu0 %v5778_v52  ;;  %2933 = vmatmul.bf16.vlgmr.msrb.gmra.mxu1 %v5776_v50  ;;  %v1942_v51 = vadd.f32 %v1941_v47, %v1929_v46  ;;  %v5384_v46 = vld [vmem:[#allocation7 + $0x1cc] sm:$0xf]  ;;  %v4667_v47 = vld [vmem:[#allocation7 + $0x1d8] sm:$0xf0] }
 0x15c   :  { %2964 = vmatpush.bf16.msra.mxu0 %v4554_v0  ;;  %2977 = vmatpush.bf16.msra.mxu1 %v4682_v3  ;;  %v5334_v0 = vld [vmem:[#allocation7 + $0x34] sm:$0xf0]  ;;  %v4670_v54 = vor.u32 %v5384_v46, %v4667_v47 }
 0x15d   :  { %v4458_v14 = vor.u32 %v5334_v0, %v4457_v63  ;;  %v4526_v63 = vor.u32 %v5348_v33, %v4523_v56  ;;  %v5420_v33 = vld [vmem:[#allocation7 + $0x2ec] sm:$0xf]  ;;  %v4811_v56 = vld [vmem:[#allocation7 + $0x2f8] sm:$0xf0] }
 0x15e   :  { %2905 = vmatpush.bf16.msra.mxu3 %v4834_v2  ;;  %v5344_v2 = vld [vmem:[#allocation7 + $0x8c] sm:$0xf] }
 0x160   :  { %2965 = vmatpush.bf16.msra.mxu0 %v4538_v11  ;;  %2978 = vmatpush.bf16.msra.mxu1 %v4666_v18  ;;  %v1967_v59 = vpop.f32.mrf.mxu3  ;;  %v1930_v25 = vpop.f32.mrf.mxu0  ;;  %v4817_v18 = vld [vmem:[#allocation7 + $0x300] sm:$0xf] }
 0x161   :  { %v1954_v57 = vpop.f32.mrf.mxu2  ;;  %v1943_v12 = vpop.f32.mrf.mxu1  ;;  %v4818_v23 = vor.u32 %v5425_v19, %v4817_v18  ;;  %v5406_v25 = vld [vmem:[#allocation7 + $0x274] sm:$0xf0]  ;;  %v5340_v18 = vld [vmem:[#allocation7 + $0x6c] sm:$0xf]  ;;  %v4491_v19 = vld [vmem:[#allocation7 + $0x78] sm:$0xf0] }
 0x162   :  { %v1955_v58 = vadd.f32 %v1954_v57, %v1942_v51  ;;  %v4542_v51 = vor.u32 %v5352_v40, %v4539_v34  ;;  %v5380_v57 = vld [vmem:[#allocation7 + $0x1ac] sm:$0xf]  ;;  %v5435_v12 = vld [vmem:[#allocation7 + $0x364] sm:$0xf]  ;;  %v4746_v17 = vor.u32 %v5406_v25, %v4745_v15  ;;  %v4835_v40 = vld [vmem:[#allocation7 + $0x330] sm:$0xf0] }
 0x163   :  { %2906 = vmatpush.bf16.msra.mxu3 %v4818_v23  ;;  %v4795_v15 = vld [vmem:[#allocation7 + $0x2d8] sm:$0xf0] }
 0x164   :  { %2966 = vmatpush.bf16.msra.mxu0 %v4522_v16  ;;  %2979 = vmatpush.bf16.msra.mxu1 %v4650_v30  ;;  %v1968_v3 = vadd.f32 %v1967_v59, %v1955_v58  ;;  %v5451_v16 = vld [vmem:[#allocation7 + $0x3e4] sm:$0xf]  ;;  %v5388_v30 = vld [vmem:[#allocation7 + $0x1ec] sm:$0xf]  ;;  %v4651_v58 = vld [vmem:[#allocation7 + $0x1b8] sm:$0xf0] }
 0x165   :  { %v4934_v7 = vor.u32 %v5451_v16, %v4931_v31  ;;  %v4686_v44 = vor.u32 %v5388_v30, %v4683_v13  ;;  %v4761_v59 = vld [vmem:[#allocation7 + $0x288] sm:$0xf]  ;;  %v4654_v0 = vor.u32 %v5380_v57, %v4651_v58  ;;  %v5431_v31 = vld [vmem:[#allocation7 + $0x344] sm:$0xf]  ;;  %v4851_v13 = vld [vmem:[#allocation7 + $0x350] sm:$0xf0] }
 0x166   :  { %v2077_v11 = vmax.f32 %v1968_v3, 0.0  ;;  %v4507_v3 = vld [vmem:[#allocation7 + $0x98] sm:$0xf0]  ;;  %v4854_v28 = vor.u32 %v5431_v31, %v4851_v13 }
 0x167   :  { %2951 = vmatpush.bf16.msrb.mxu3 %v4934_v7  ;;  %v4475_v7 = vld [vmem:[#allocation7 + $0x58] sm:$0xf0] }
 0x168   :  { %2967 = vmatpush.bf16.msra.mxu0 %v4506_v39  ;;  %2980 = vmatpush.bf16.msra.mxu1 %v4634_v42  ;;  %v5796_v24 = vpack.c.bf16 %v2077_v11, %v2077_v11  ;;  %v4442_v39 = vor.u32 %v5330_v10, %v4441_v5  ;;  %v1969_v26 = vpop.f32.mrf.mxu3  ;;  %v4558_v42 = vor.u32 %v5356_v4, %v4555_v29  ;;  %v4867_v11 = vld [vmem:[#allocation7 + $0x370] sm:$0xf0]  ;;  %v5402_v4 = vld [vmem:[#allocation7 + $0x254] sm:$0xf0] }
 0x169   :  { %v1956_v36 = vpop.f32.mrf.mxu2  ;;  %v4510_v10 = vor.u32 %v5344_v2, %v4507_v3  ;;  %v4870_v23 = vor.u32 %v5435_v12, %v4867_v11  ;;  %v4494_v29 = vor.u32 %v5340_v18, %v4491_v19  ;;  %v4730_v35 = vor.u32 %v5402_v4, %v4729_v22  ;;  %v4603_v26 = vld [vmem:[#allocation7 + $0x158] sm:$0xf0] }
 0x16a   :  { %2894 = vmatmul.bf16.vlgmr.msra.gmra.mxu2 %v5796_v24  ;;  %v5336_v36 = vld [vmem:[#allocation7 + $0x4c] sm:$0xf]  ;;  %v4571_v2 = vld [vmem:[#allocation7 + $0x118] sm:$0xf0] }
 0x16b   :  { %2990 = vmatpush.bf16.msra.mxu2 %v4810_v21  ;;  %2952 = vmatpush.bf16.msrb.mxu3 %v4918_v27  ;;  %v4619_v21 = vld [vmem:[#allocation7 + $0x178] sm:$0xf0]  ;;  %v4478_v43 = vor.u32 %v5336_v36, %v4475_v7  ;;  %v5364_v27 = vld [vmem:[#allocation7 + $0x12c] sm:$0xf] }
 0x16c   :  { %2968 = vmatpush.bf16.msra.mxu0 %v4490_v38  ;;  %2981 = vmatpush.bf16.msra.mxu1 %v4618_v48  ;;  %v4777_v38 = vld [vmem:[#allocation7 + $0x2a8] sm:$0xf]  ;;  %v5443_v48 = vld [vmem:[#allocation7 + $0x3a4] sm:$0xf]  ;;  %v4779_v18 = vld [vmem:[#allocation7 + $0x2b8] sm:$0xf0] }
 0x16d   :  { %v4778_v55 = vor.u32 %v5414_v49, %v4777_v38  ;;  %v4902_v61 = vor.u32 %v5443_v48, %v4899_v53  ;;  %v5332_v38 = vld [vmem:[#allocation7 + $0x2c] sm:$0xf]  ;;  %v4459_v49 = vld [vmem:[#allocation7 + $0x38] sm:$0xf0]  ;;  %v4697_v48 = vld [vmem:[#allocation7 + $0x208] sm:$0xf] }
 0x16e   :  { %v5394_v53 = vld [vmem:[#allocation7 + $0x214] sm:$0xf0]  ;;  %v4462_v57 = vor.u32 %v5332_v38, %v4459_v49  ;;  %v5396_v7 = vld [vmem:[#allocation7 + $0x22c] sm:$0xf] }
 0x16f   :  { %2991 = vmatpush.bf16.msra.mxu2 %v4794_v45  ;;  %2953 = vmatpush.bf16.msrb.mxu3 %v4902_v61  ;;  %v5427_v45 = vld [vmem:[#allocation7 + $0x324] sm:$0xf] }
 0x170   :  { %2969 = vmatpush.bf16.msra.mxu0 %v4474_v60  ;;  %2982 = vmatpush.bf16.msra.mxu1 %v4602_v8  ;;  %v5410_v60 = vld [vmem:[#allocation7 + $0x294] sm:$0xf0]  ;;  %v4883_v8 = vld [vmem:[#allocation7 + $0x390] sm:$0xf0] }
 0x171   :  { %v4762_v1 = vor.u32 %v5410_v60, %v4761_v59  ;;  %v4886_v5 = vor.u32 %v5439_v62, %v4883_v8  ;;  %v5423_v59 = vld [vmem:[#allocation7 + $0x304] sm:$0xf]  ;;  %v4819_v60 = vld [vmem:[#allocation7 + $0x310] sm:$0xf0]  ;;  %v4698_v62 = vor.u32 %v5394_v53, %v4697_v48  ;;  %v5328_v8 = vld [vmem:[#allocation7 + $0xc] sm:$0xf] }
 0x172   :  { %v4822_v3 = vor.u32 %v5423_v59, %v4819_v60  ;;  %v4921_v48 = vld [vmem:[#allocation7 + $0x3c8] sm:$0xf]  ;;  %v5450_v53 = vld [vmem:[#allocation7 + $0x3d4] sm:$0xf0] }
 0x173   :  { %2992 = vmatpush.bf16.msra.mxu2 %v4778_v55  ;;  %2954 = vmatpush.bf16.msrb.mxu3 %v4886_v5  ;;  %v4889_v59 = vld [vmem:[#allocation7 + $0x388] sm:$0xf]  ;;  %v5442_v60 = vld [vmem:[#allocation7 + $0x394] sm:$0xf0] }
 0x174   :  { %2970 = vmatpush.bf16.msra.mxu0 %v4458_v14  ;;  %2983 = vmatpush.bf16.msra.mxu1 %v4586_v20  ;;  %v4638_v14 = vor.u32 %v5376_v9, %v4635_v6  ;;  %v5372_v20 = vld [vmem:[#allocation7 + $0x16c] sm:$0xf]  ;;  %v374_v9 = vperm.slane %v5788_v37, 3 }
 0x175   :  { %v4622_v32 = vor.u32 %v5372_v20, %v4619_v21  ;;  %v5416_v6 = vld [vmem:[#allocation7 + $0x2cc] sm:$0xf]  ;;  %v4763_v21 = vld [vmem:[#allocation7 + $0x298] sm:$0xf0] }
 0x176   :  { %v4798_v11 = vor.u32 %v5416_v6, %v4795_v15  ;;  %v5408_v20 = vld [vmem:[#allocation7 + $0x28c] sm:$0xf] }
 0x177   :  { %2993 = vmatpush.bf16.msra.mxu2 %v4762_v1  ;;  %2955 = vmatpush.bf16.msrb.mxu3 %v4870_v23  ;;  %v5360_v1 = vld [vmem:[#allocation7 + $0x10c] sm:$0xf]  ;;  %v4766_v22 = vor.u32 %v5408_v20, %v4763_v21 }
 0x178   :  { %2971 = vmatpush.bf16.msra.mxu0 %v4442_v39  ;;  %2984 = vmatpush.bf16.msra.mxu1 %v4570_v41  ;;  %v5802_v16 = vpop.f32.mrf.mxu0  ;;  %v5804_v30 = vpop.f32.mrf.mxu1  ;;  %v5368_v39 = vld [vmem:[#allocation7 + $0x14c] sm:$0xf]  ;;  %v4713_v41 = vld [vmem:[#allocation7 + $0x228] sm:$0xf] }
 0x179   :  { %v4606_v34 = vor.u32 %v5368_v39, %v4603_v26  ;;  %v5404_v23 = vld [vmem:[#allocation7 + $0x26c] sm:$0xf]  ;;  %v4715_v39 = vld [vmem:[#allocation7 + $0x238] sm:$0xf0] }
 0x17a   :  { %2946 = vmatmul.bf16.vlgmr.msrb.gmra.mxu2 %v5796_v24 }
 0x17b   :  { %2972 = vmatmul.bf16.vlgmr.msra.gmra.mxu0 %v5778_v52  ;;  %2985 = vmatmul.bf16.vlgmr.msra.gmra.mxu1 %v5776_v50 }
 0x17c   :  { %3016 = vmatpush.bf16.msrb.mxu0 %v4558_v42  ;;  %3029 = vmatpush.bf16.msrb.mxu1 %v4686_v44  ;;  %v5398_v42 = vld [vmem:[#allocation7 + $0x234] sm:$0xf0] }
 0x17d   :  { %2994 = vmatpush.bf16.msra.mxu2 %v4746_v17  ;;  %v4714_v46 = vor.u32 %v5398_v42, %v4713_v41  ;;  %2956 = vmatpush.bf16.msrb.mxu3 %v4854_v28  ;;  %v5412_v17 = vld [vmem:[#allocation7 + $0x2ac] sm:$0xf]  ;;  %v4718_v41 = vor.u32 %v5396_v7, %v4715_v39 }
 0x17e   :  { %v4782_v37 = vor.u32 %v5412_v17, %v4779_v18  ;;  %v5426_v17 = vld [vmem:[#allocation7 + $0x314] sm:$0xf0] }
 0x180   :  { %3017 = vmatpush.bf16.msrb.mxu0 %v4542_v51  ;;  %3030 = vmatpush.bf16.msrb.mxu1 %v4670_v54  ;;  %v2019_v47 = vpop.f32.mrf.mxu3  ;;  %v4587_v51 = vld [vmem:[#allocation7 + $0x138] sm:$0xf0]  ;;  %v4838_v54 = vor.u32 %v5427_v45, %v4835_v40  ;;  %v1982_v55 = vpop.f32.mrf.mxu0 }
 0x181   :  { %v5806_v44 = vpop.f32.mrf.mxu2  ;;  %2995 = vmatpush.bf16.msra.mxu2 %v4730_v35  ;;  %v1995_v58 = vpop.f32.mrf.mxu1  ;;  %v4590_v61 = vor.u32 %v5364_v27, %v4587_v51  ;;  %v4731_v35 = vld [vmem:[#allocation7 + $0x258] sm:$0xf0] }
 0x182   :  { %2957 = vmatpush.bf16.msrb.mxu3 %v4838_v54  ;;  %v4699_v45 = vld [vmem:[#allocation7 + $0x218] sm:$0xf0] }
 0x184   :  { %3018 = vmatpush.bf16.msrb.mxu0 %v4526_v63  ;;  %3031 = vmatpush.bf16.msrb.mxu1 %v4654_v0  ;;  %v4443_v63 = vld [vmem:[#allocation7 + $0x18] sm:$0xf0]  ;;  %v4814_v0 = vor.u32 %v5420_v33, %v4811_v56  ;;  %v4922_v33 = vor.u32 %v5450_v53, %v4921_v48  ;;  %v4905_v56 = vld [vmem:[#allocation7 + $0x3a8] sm:$0xf] }
 0x185   :  { %2996 = vmatpush.bf16.msra.mxu2 %v4714_v46  ;;  %v4446_v25 = vor.u32 %v5328_v8, %v4443_v63  ;;  %v4937_v46 = vld [vmem:[#allocation7 + $0x3e8] sm:$0xf]  ;;  %v5438_v63 = vld [vmem:[#allocation7 + $0x374] sm:$0xf0] }
 0x186   :  { %2958 = vmatpush.bf16.msrb.mxu3 %v4822_v3  ;;  %v4873_v8 = vld [vmem:[#allocation7 + $0x368] sm:$0xf] }
 0x187   :  { %v4857_v3 = vld [vmem:[#allocation7 + $0x348] sm:$0xf] }
 0x188   :  { %3019 = vmatpush.bf16.msrb.mxu0 %v4510_v10  ;;  %3032 = vmatpush.bf16.msrb.mxu1 %v4638_v14  ;;  %v4574_v10 = vor.u32 %v5360_v1, %v4571_v2  ;;  %v2021_v12 = vpop.f32.mrf.mxu3  ;;  %v1981_v14 = vadd.f32 %v5802_v16, %v374_v9  ;;  %v4747_v16 = vld [vmem:[#allocation7 + $0x278] sm:$0xf0]  ;;  %v4874_v1 = vor.u32 %v5438_v63, %v4873_v8  ;;  %v5434_v9 = vld [vmem:[#allocation7 + $0x354] sm:$0xf0]  ;;  %v5459_v63 = vld [vmem:[#allocation8 + $0x20] sm:$0xff] }
 0x189   :  { %v2008_v5 = vpop.f32.mrf.mxu2  ;;  %2997 = vmatpush.bf16.msra.mxu2 %v4698_v62  ;;  %v4890_v62 = vor.u32 %v5442_v60, %v4889_v59  ;;  %v5460_v60 = vld [vmem:[#allocation8 + $0x28] sm:$0xff]  ;;  %v5470_v8 = vld [vmem:[#allocation8 + $0x78] sm:$0xff] }
 0x18a   :  { %v1994_v19 = vadd.f32 %v5804_v30, %v1981_v14  ;;  %v4841_v5 = vld [vmem:[#allocation7 + $0x328] sm:$0xf] }
 0x18b   :  { %v4825_v14 = vld [vmem:[#allocation7 + $0x308] sm:$0xf] }
 0x18c   :  { %3020 = vmatpush.bf16.msrb.mxu0 %v4494_v29  ;;  %3033 = vmatpush.bf16.msrb.mxu1 %v4622_v32  ;;  %v2007_v4 = vadd.f32 %v5806_v44, %v1994_v19  ;;  %v4750_v29 = vor.u32 %v5404_v23, %v4747_v16  ;;  %v5400_v32 = vld [vmem:[#allocation7 + $0x24c] sm:$0xf]  ;;  %v4939_v19 = vld [vmem:[#allocation7 + $0x3f8] sm:$0xf0]  ;;  %v4826_v20 = vor.u32 %v5426_v17, %v4825_v14 }
 0x18d   :  { %3042 = vmatpush.bf16.msrb.mxu2 %v4814_v0  ;;  %v5392_v44 = vld [vmem:[#allocation7 + $0x20c] sm:$0xf] }
 0x18e   :  { %2998 = vmatmul.bf16.vlgmr.msra.gmra.mxu2 %v5796_v24  ;;  %v2020_v31 = vadd.f32 %v2019_v47, %v2007_v4  ;;  %v5454_v47 = vld [vmem:[#allocation7 + $0x3f4] sm:$0xf0]  ;;  %v4702_v38 = vor.u32 %v5392_v44, %v4699_v45  ;;  %v4923_v4 = vld [vmem:[#allocation7 + $0x3d8] sm:$0xf0]  ;;  %v5444_v16 = vld [vmem:[#allocation7 + $0x3ac] sm:$0xf] }
 0x18f   :  { %v4938_v27 = vor.u32 %v5454_v47, %v4937_v46  ;;  %v5428_v44 = vld [vmem:[#allocation7 + $0x32c] sm:$0xf]  ;;  %v4843_v45 = vld [vmem:[#allocation7 + $0x338] sm:$0xf0] }
 0x190   :  { %3021 = vmatpush.bf16.msrb.mxu0 %v4478_v43  ;;  %3034 = vmatpush.bf16.msrb.mxu1 %v4606_v34  ;;  %v5424_v46 = vld [vmem:[#allocation7 + $0x30c] sm:$0xf]  ;;  %v4827_v47 = vld [vmem:[#allocation7 + $0x318] sm:$0xf0] }
 0x191   :  { %3043 = vmatpush.bf16.msrb.mxu2 %v4798_v11 }
 0x194   :  { %3022 = vmatpush.bf16.msrb.mxu0 %v4462_v57  ;;  %3035 = vmatpush.bf16.msrb.mxu1 %v4590_v61  ;;  %v5446_v57 = vld [vmem:[#allocation7 + $0x3b4] sm:$0xf0]  ;;  %v5819_v61 = vld [vmem:[#allocation10 + $0x4] sm:$0xf] }
 0x195   :  { %3044 = vmatpush.bf16.msrb.mxu2 %v4782_v37  ;;  %v4906_v58 = vor.u32 %v5446_v57, %v4905_v56  ;;  %v2212_v0 = vperm.slane %v5819_v61, 0  ;;  %v5452_v37 = vld [vmem:[#allocation7 + $0x3ec] sm:$0xf]  ;;  %v5461_v57 = vld [vmem:[#allocation8 + $0x30] sm:$0xff] }
 0x196   :  { %v4942_v21 = vor.u32 %v5452_v37, %v4939_v19  ;;  %v5478_v37 = vld [vmem:[#allocation8 + $0xb8] sm:$0xff] }
 0x198   :  { %3023 = vmatpush.bf16.msrb.mxu0 %v4446_v25  ;;  %3036 = vmatpush.bf16.msrb.mxu1 %v4574_v10  ;;  %v2032_v13 = vpop.f32.mrf.mxu0  ;;  %v2045_v36 = vpop.f32.mrf.mxu1  ;;  %v4858_v25 = vor.u32 %v5434_v9, %v4857_v3  ;;  %v5430_v10 = vld [vmem:[#allocation7 + $0x334] sm:$0xf0]  ;;  %v2215_v9 = vperm.slane %v5819_v61, 3 }
 0x199   :  { %3045 = vmatpush.bf16.msrb.mxu2 %v4766_v22  ;;  %v2033_v30 = vadd.f32 %v2032_v13, %v2020_v31  ;;  %v4842_v12 = vor.u32 %v5430_v10, %v4841_v5  ;;  %v5448_v22 = vld [vmem:[#allocation7 + $0x3cc] sm:$0xf] }
 0x19a   :  { %v4926_v23 = vor.u32 %v5448_v22, %v4923_v4  ;;  %v5440_v13 = vld [vmem:[#allocation7 + $0x38c] sm:$0xf] }
 0x19b   :  { %3024 = vmatmul.bf16.vlgmr.msrb.gmra.mxu0 %v5778_v52  ;;  %3037 = vmatmul.bf16.vlgmr.msrb.gmra.mxu1 %v5776_v50  ;;  %v4734_v52 = vor.u32 %v5400_v32, %v4731_v35  ;;  %v2046_v26 = vadd.f32 %v2045_v36, %v2033_v30  ;;  %v4891_v32 = vld [vmem:[#allocation7 + $0x398] sm:$0xf0]  ;;  %v5436_v36 = vld [vmem:[#allocation7 + $0x36c] sm:$0xf] }
 0x19c   :  { %v4894_v35 = vor.u32 %v5440_v13, %v4891_v32  ;;  %v4875_v30 = vld [vmem:[#allocation7 + $0x378] sm:$0xf0]  ;;  %3348 = vmatpush.bf16.msra.mxu1 %v5470_v8  ;;  %v5464_v4 = vld [vmem:[#allocation8 + $0x48] sm:$0xff]  ;;  %v5473_v13 = vld [vmem:[#allocation8 + $0x90] sm:$0xff] }
 0x19d   :  { %3046 = vmatpush.bf16.msrb.mxu2 %v4750_v29  ;;  %v4907_v29 = vld [vmem:[#allocation7 + $0x3b8] sm:$0xf0]  ;;  %v4878_v7 = vor.u32 %v5436_v36, %v4875_v30 }
 0x19e   :  { %v4910_v31 = vor.u32 %v5444_v16, %v4907_v29  ;;  %v5463_v16 = vld [vmem:[#allocation8 + $0x40] sm:$0xff] }
 0x19f   :  { %v5475_v29 = vld [vmem:[#allocation8 + $0xa0] sm:$0xff] }
 0x1a0   :  { %v2058_v50 = vpop.f32.mrf.mxu2  ;;  %v2071_v28 = vpop.f32.mrf.mxu3 }
 0x1a1   :  { %3047 = vmatpush.bf16.msrb.mxu2 %v4734_v52  ;;  %v2059_v42 = vadd.f32 %v2058_v50, %v2046_v26  ;;  %v2034_v43 = vpop.f32.mrf.mxu0  ;;  %v2047_v40 = vpop.f32.mrf.mxu1  ;;  %v2213_v52 = vperm.slane %v5819_v61, 1  ;;  %v5432_v26 = vld [vmem:[#allocation7 + $0x34c] sm:$0xf]  ;;  %v4859_v50 = vld [vmem:[#allocation7 + $0x358] sm:$0xf0] }
 0x1a2   :  { %v4862_v43 = vor.u32 %v5432_v26, %v4859_v50  ;;  %v4846_v40 = vor.u32 %v5428_v44, %v4843_v45  ;;  %v5486_v26 = vld [vmem:[#allocation8 + $0xf8] sm:$0xff]  ;;  %v5483_v45 = vld [vmem:[#allocation8 + $0xe0] sm:$0xff] }
 0x1a3   :  { %v2072_v34 = vadd.f32 %v2071_v28, %v2059_v42 }
 0x1a5   :  { %3048 = vmatpush.bf16.msrb.mxu2 %v4718_v41  ;;  %v2078_v49 = vmax.f32 %v2072_v34, 0.0 }
 0x1a7   :  { %v5815_v51 = vpack.c.bf16 %v2078_v49, %v2078_v49  ;;  %v4830_v49 = vor.u32 %v5424_v46, %v4827_v47  ;;  %v5482_v46 = vld [vmem:[#allocation8 + $0xd8] sm:$0xff] }
 0x1a8   :  { %v2060_v54 = vpop.f32.mrf.mxu2  ;;  %v2073_v55 = vpop.f32.mrf.mxu3 }
 0x1a9   :  { %3049 = vmatpush.bf16.msrb.mxu2 %v4702_v38  ;;  %2907 = vmatmul.bf16.vlgmr.msra.gmra.mxu3 %v5815_v51 }
 0x1aa   :  { %3003 = vmatpush.bf16.msra.mxu3 %v4938_v27  ;;  %v2214_v27 = vperm.slane %v5819_v61, 2  ;;  %v5465_v61 = vld [vmem:[#allocation8 + $0x50] sm:$0xff] }
 0x1ac   :  { %3050 = vmatmul.bf16.vlgmr.msrb.gmra.mxu2 %v5796_v24 }
 0x1ad   :  { %3361 = vmatpush.bf16.msra.mxu2 %v5478_v37 }
 0x1ae   :  { %3004 = vmatpush.bf16.msra.mxu3 %v4922_v33  ;;  %v5462_v33 = vld [vmem:[#allocation8 + $0x38] sm:$0xff] }
 0x1af   :  { %3335 = vmatpush.bf16.msra.mxu0 %v5462_v33 }
 0x1b2   :  { %3005 = vmatpush.bf16.msra.mxu3 %v4906_v58 }
 0x1b3   :  { %3336 = vmatpush.bf16.msra.mxu0 %v5461_v57 }
 0x1b6   :  { %3006 = vmatpush.bf16.msra.mxu3 %v4890_v62 }
 0x1b7   :  { %3337 = vmatpush.bf16.msra.mxu0 %v5460_v60 }
 0x1b8   :  { %v2869_v2 = vpop.f32.mrf.mxu0  ;;  %v2882_v6 = vpop.f32.mrf.mxu1 }
 0x1b9   :  { %v2870_v24 = vadd.f32 %v2869_v2, %v2212_v0  ;;  %2959 = vmatmul.bf16.vlgmr.msrb.gmra.mxu3 %v5815_v51  ;;  %v5457_v2 = vld [vmem:[#allocation8 + $0x10] sm:$0xff] }
 0x1ba   :  { %3007 = vmatpush.bf16.msra.mxu3 %v4874_v1  ;;  %v5458_v1 = vld [vmem:[#allocation8 + $0x18] sm:$0xff] }
 0x1bb   :  { %v5823_v15 = vadd.f32 %v2882_v6, %v2870_v24  ;;  %3338 = vmatpush.bf16.msra.mxu0 %v5459_v63  ;;  %v5456_v24 = vld [vmem:[#allocation8 + $0x8] sm:$0xff] }
 0x1bc   :  { %v5468_v6 = vld [vmem:[#allocation8 + $0x68] sm:$0xff] }
 0x1be   :  { %3008 = vmatpush.bf16.msra.mxu3 %v4858_v25 }
 0x1bf   :  { %3339 = vmatpush.bf16.msra.mxu0 %v5458_v1 }
 0x1c0   :  { %v2871_v11 = vpop.f32.mrf.mxu0  ;;  %v2884_v18 = vpop.f32.mrf.mxu1 }
 0x1c1   :  { %v5467_v11 = vld [vmem:[#allocation8 + $0x60] sm:$0xff]  ;;  %v5466_v18 = vld [vmem:[#allocation8 + $0x58] sm:$0xff] }
 0x1c2   :  { %3009 = vmatpush.bf16.msra.mxu3 %v4842_v12  ;;  %v5455_v12 = vld [vmem:[#allocation8] sm:$0xff] }
 0x1c3   :  { %3340 = vmatpush.bf16.msra.mxu0 %v5457_v2 }
 0x1c6   :  { %3010 = vmatpush.bf16.msra.mxu3 %v4826_v20  ;;  %v5477_v20 = vld [vmem:[#allocation8 + $0xb0] sm:$0xff] }
 0x1c7   :  { %3341 = vmatpush.bf16.msra.mxu0 %v5456_v24  ;;  %3362 = vmatpush.bf16.msra.mxu2 %v5477_v20  ;;  %v5497_v24 = vld [vmem:[#allocation10 + $0x8] ss:$0 sm:$0xff] }
 0x1c9   :  { %3011 = vmatmul.bf16.vlgmr.msra.gmra.mxu3 %v5815_v51 }
 0x1ca   :  { %3055 = vmatpush.bf16.msrb.mxu3 %v4942_v21 }
 0x1cb   :  { %3342 = vmatpush.bf16.msra.mxu0 %v5455_v12 }
 0x1ce   :  { %3056 = vmatpush.bf16.msrb.mxu3 %v4926_v23  ;;  %v5476_v23 = vld [vmem:[#allocation8 + $0xa8] sm:$0xff] }
 0x1cf   :  { %3363 = vmatpush.bf16.msra.mxu2 %v5476_v23 }
 0x1d2   :  { %3057 = vmatpush.bf16.msrb.mxu3 %v4910_v31  ;;  %v5474_v31 = vld [vmem:[#allocation8 + $0x98] sm:$0xff] }
 0x1d3   :  { %3364 = vmatpush.bf16.msra.mxu2 %v5475_v29 }
 0x1d6   :  { %3058 = vmatpush.bf16.msrb.mxu3 %v4894_v35  ;;  %v5472_v35 = vld [vmem:[#allocation8 + $0x88] sm:$0xff] }
 0x1d7   :  { %3365 = vmatpush.bf16.msra.mxu2 %v5474_v31 }
 0x1d8   :  { %v2921_v39 = vpop.f32.mrf.mxu0  ;;  %v2934_v42 = vpop.f32.mrf.mxu1 }
 0x1d9   :  { %v2922_v41 = vadd.f32 %v2921_v39, %v2213_v52  ;;  %v5471_v39 = vld [vmem:[#allocation8 + $0x80] sm:$0xff] }
 0x1da   :  { %3059 = vmatpush.bf16.msrb.mxu3 %v4878_v7 }
 0x1db   :  { %v5827_v28 = vadd.f32 %v2934_v42, %v2922_v41  ;;  %3366 = vmatpush.bf16.msra.mxu2 %v5473_v13  ;;  %v5485_v41 = vld [vmem:[#allocation8 + $0xf0] sm:$0xff] }
 0x1de   :  { %3060 = vmatpush.bf16.msrb.mxu3 %v4862_v43  ;;  %v5484_v43 = vld [vmem:[#allocation8 + $0xe8] sm:$0xff] }
 0x1df   :  { %3367 = vmatpush.bf16.msra.mxu2 %v5472_v35 }
 0x1e0   :  { %v2923_v34 = vpop.f32.mrf.mxu0  ;;  %v2936_v38 = vpop.f32.mrf.mxu1 }
 0x1e2   :  { %3061 = vmatpush.bf16.msrb.mxu3 %v4846_v40 }
 0x1e3   :  { %3368 = vmatpush.bf16.msra.mxu2 %v5471_v39 }
 0x1e6   :  { %3062 = vmatpush.bf16.msrb.mxu3 %v4830_v49  ;;  %v5481_v49 = vld [vmem:[#allocation8 + $0xd0] sm:$0xff] }
 0x1e9   :  { %3063 = vmatmul.bf16.vlgmr.msrb.gmra.mxu3 %v5815_v51  ;;  %v5469_v51 = vld [vmem:[#allocation8 + $0x70] sm:$0xff] }
 0x1ea   :  { %3349 = vmatpush.bf16.msra.mxu1 %v5469_v51  ;;  %3374 = vmatpush.bf16.msra.mxu3 %v5486_v26 }
 0x1ed   :  { %v5831_v48 = vpop.f32.mrf.mxu2 }
 0x1ee   :  { %3350 = vmatpush.bf16.msra.mxu1 %v5468_v6  ;;  %v2896_v32 = vadd.f32 %v5831_v48, %v5823_v15  ;;  %3375 = vmatpush.bf16.msra.mxu3 %v5485_v41  ;;  %v5480_v48 = vld [vmem:[#allocation8 + $0xc8] sm:$0xff] }
 0x1f2   :  { %3351 = vmatpush.bf16.msra.mxu1 %v5467_v11  ;;  %3376 = vmatpush.bf16.msra.mxu3 %v5484_v43 }
 0x1f5   :  { %v2897_v58 = vpop.f32.mrf.mxu2 }
 0x1f6   :  { %3352 = vmatpush.bf16.msra.mxu1 %v5466_v18  ;;  %3377 = vmatpush.bf16.msra.mxu3 %v5483_v45 }
 0x1f8   :  { %v2973_v53 = vpop.f32.mrf.mxu0  ;;  %v2986_v55 = vpop.f32.mrf.mxu1 }
 0x1f9   :  { %v2974_v54 = vadd.f32 %v2973_v53, %v2214_v27 }
 0x1fa   :  { %3353 = vmatpush.bf16.msra.mxu1 %v5465_v61  ;;  %3378 = vmatpush.bf16.msra.mxu3 %v5482_v46 }
 0x1fb   :  { %v5833_v56 = vadd.f32 %v2986_v55, %v2974_v54  ;;  %v5479_v54 = vld [vmem:[#allocation8 + $0xc0] sm:$0xff] }
 0x1fd   :  { %v5835_v0 = vpop.f32.mrf.mxu2 }
 0x1fe   :  { %3354 = vmatpush.bf16.msra.mxu1 %v5464_v4  ;;  %v2948_v15 = vadd.f32 %v5835_v0, %v5827_v28  ;;  %3379 = vmatpush.bf16.msra.mxu3 %v5481_v49 }
 0x200   :  { %v2975_v59 = vpop.f32.mrf.mxu0  ;;  %v2988_v62 = vpop.f32.mrf.mxu1 }
 0x202   :  { %3355 = vmatpush.bf16.msra.mxu1 %v5463_v16  ;;  %3380 = vmatpush.bf16.msra.mxu3 %v5480_v48 }
 0x205   :  { %v2949_v3 = vpop.f32.mrf.mxu2 }
 0x206   :  { %3381 = vmatpush.bf16.msra.mxu3 %v5479_v54 }
 0x211   :  { %v2999_v17 = vpop.f32.mrf.mxu2 }
 0x212   :  { %v3000_v53 = vadd.f32 %v2999_v17, %v5833_v56 }
 0x218   :  { %v3025_v25 = vpop.f32.mrf.mxu0  ;;  %v3038_v10 = vpop.f32.mrf.mxu1 }
 0x219   :  { %v3026_v5 = vadd.f32 %v3025_v25, %v2215_v9  ;;  %v3001_v22 = vpop.f32.mrf.mxu2 }
 0x21b   :  { %v5838_v14 = vadd.f32 %v3038_v10, %v3026_v5 }
 0x220   :  { %v3027_v19 = vpop.f32.mrf.mxu0  ;;  %v3040_v21 = vpop.f32.mrf.mxu1 }
 0x22c   :  { %v2908_v36 = vpop.f32.mrf.mxu3 }
 0x22d   :  { %v2909_v30 = vadd.f32 %v2908_v36, %v2896_v32 }
 0x22f   :  { %v3051_v52 = vpop.f32.mrf.mxu2  ;;  %v3068_v7 = vmax.f32 %v2909_v30, 0.0 }
 0x230   :  { %v3052_v59 = vadd.f32 %v3051_v52, %v5838_v14 }
 0x231   :  { %v3072_v50 = vpack.c.bf16 %v3068_v7, %v3068_v7 }
 0x233   :  { %3343 = vmatmul.bf16.vlgmr.msra.gmra.mxu0 %v3072_v50 }
 0x234   :  { %v2910_v42 = vpop.f32.mrf.mxu3 }
 0x237   :  { %v3053_v44 = vpop.f32.mrf.mxu2 }
 0x23c   :  { %v2960_v40 = vpop.f32.mrf.mxu3 }
 0x23d   :  { %v2961_v34 = vadd.f32 %v2960_v40, %v2948_v15 }
 0x23f   :  { %v3069_v47 = vmax.f32 %v2961_v34, 0.0 }
 0x241   :  { %v3073_v38 = vpack.c.bf16 %v3069_v47, %v3069_v47 }
 0x243   :  { %3356 = vmatmul.bf16.vlgmr.msra.gmra.mxu1 %v3073_v38 }
 0x244   :  { %v2962_v27 = vpop.f32.mrf.mxu3 }
 0x24c   :  { %v3012_v55 = vpop.f32.mrf.mxu3 }
 0x24d   :  { %v3013_v33 = vadd.f32 %v3012_v55, %v3000_v53 }
 0x24f   :  { %v3070_v28 = vmax.f32 %v3013_v33, 0.0 }
 0x251   :  { %v3074_v57 = vpack.c.bf16 %v3070_v28, %v3070_v28 }
 0x253   :  { %3369 = vmatmul.bf16.vlgmr.msra.gmra.mxu2 %v3074_v57 }
 0x254   :  { %v3014_v58 = vpop.f32.mrf.mxu3 }
 0x26c   :  { %v3064_v60 = vpop.f32.mrf.mxu3 }
 0x26d   :  { %v3065_v62 = vadd.f32 %v3064_v60, %v3052_v59 }
 0x26f   :  { %v3071_v8 = vmax.f32 %v3065_v62, 0.0 }
 0x271   :  { %v3075_v51 = vpack.c.bf16 %v3071_v8, %v3071_v8 }
 0x273   :  { %3382 = vmatmul.bf16.vlgmr.msra.gmra.mxu3 %v3075_v51 }
 0x274   :  { %v3066_v63 = vpop.f32.mrf.mxu3 }
 0x2b0   :  { %v3344_v0 = vpop.f32.mrf.mxu0 }
 0x2b1   :  { %v3345_v6 = vadd.f32 %v5497_v24, %v3344_v0 }
 0x2b8   :  { %v3346_v1 = vpop.f32.mrf.mxu0 }
 0x2c0   :  { %v3357_v2 = vpop.f32.mrf.mxu1 }
 0x2c1   :  { %v3358_v25 = vadd.f32 %v3357_v2, %v3345_v6 }
 0x2c8   :  { %v3359_v56 = vpop.f32.mrf.mxu1 }
 0x2d6   :  { %v3370_v3 = vpop.f32.mrf.mxu2 }
 0x2d7   :  { %v3371_v5 = vadd.f32 %v3370_v3, %v3358_v25 }
 0x2de   :  { %v3372_v9 = vpop.f32.mrf.mxu2 }
 0x2f6   :  { %v3383_v10 = vpop.f32.mrf.mxu3 }
 0x2f7   :  { %v3384_v12 = vadd.f32 %v3383_v10, %v3371_v5 }
 0x2f9   :  { %3387 = vst [vmem:[#allocation11] sm:$0xff] %v3384_v12 }
 0x2fa   :  { %3398 = dma.vmem_to_hbm [thread:$0]  %s3394_s4, 128, %s3396_s21, [#allocation4]  }
 0x2fe   :  { %v3385_v11 = vpop.f32.mrf.mxu3 }
 0x2ff   :  { %5649 = dma.done.wait [#allocation4], 128  }
 0x300   :  { %5650 = vsyncadd [#allocation4], 4294967168 }
 0x301   :  { %3403 = vsyncpa [#allocation3], 1 }
 0x302   :  { %3404 = vsyncpa [#allocation6], 1 }
 0x303   :  { %3405 = vsyncpa [#allocation9], 1 }
 0x304   :  { %3406 = vsyncpa [#allocation4], 1 }

</bundles_post_ra>
